<compile_context>
chip_gen: v5e
topology: v5e:2x2
jax: 0.10.0
libtpu: 0.0.40
codegen_flags: <defaults>
</compile_context>

<pallas_src>
import functools

import jax
import jax.numpy as jnp
from jax.experimental import pallas as pl
from jax.experimental.pallas import tpu as pltpu


def _round_up(n, m):
    return ((n + m - 1) // m) * m


def _rbf_tile_kernel(off_ref, x_ref, z_ref, x2_ref, z2_ref, o_ref,
                     *, dot_dtype=None):
    """One (TN, TM) output tile of exp(min(x.z^T + x2' + z2', off))."""
    x = x_ref[...]                                   # (TN, Dp) prescaled
    z = z_ref[...]                                   # (TM, Dp) prescaled
    if dot_dtype is not None:                        # opt-in bf16 MXU operands
        x = x.astype(dot_dtype)
        z = z.astype(dot_dtype)
    # x . z^T via MXU (contract feature axis of both operands; no transpose).
    xz = jax.lax.dot_general(
        x, z, (((1,), (1,)), ((), ())),
        preferred_element_type=jnp.float32)          # (TN, TM)
    # x2' already carries the 2*log_std offset; min(., off) == the r2>=0 clamp.
    expo = jnp.minimum(xz + x2_ref[...] + z2_ref[...], off_ref[0, 0])
    o_ref[...] = jnp.exp(expo).astype(o_ref.dtype)


def rbf_forward(X, Z=None, *, log_std=None, log_ls=None,
                tile_n=512, tile_m=1024,
                out_dtype=jnp.float32, dot_dtype=None):
    """Pallas RBF Gram matrix.  X: (N, D), Z: (M, D) or None (-> Z = X).

    log_std/log_ls given  -> parameterize=True branch of the PyTorch module.
    out_dtype / dot_dtype -> opt-in bf16 paths (change numerics ~3e-3 rel).
    """
    if Z is None:
        Z = X
    assert X.shape[1] == Z.shape[1], "feature dims must match"
    N, D = X.shape
    M = Z.shape[0]

    X = X.astype(jnp.float32)
    Z = Z.astype(jnp.float32)

    # ---- hoisted scale / norm / offset work (O(N*D + M*D), done once) ------
    if log_ls is not None:
        inv_ls = 1.0 / jnp.exp(log_ls.astype(jnp.float32))
        X = X * inv_ls[None, :]
        Z = Z * inv_ls[None, :]
        off = 2.0 * jnp.reshape(log_std.astype(jnp.float32), ())
    else:
        off = jnp.float32(0.0)

    x2p = off - 0.5 * jnp.sum(X * X, axis=1, keepdims=True)    # (N, 1)
    z2p = (-0.5 * jnp.sum(Z * Z, axis=1))[None, :]              # (1, M)
    off2d = jnp.reshape(off, (1, 1))

    # ---- feature-axis zero pad only (keeps the contraction garbage-free) ---
    Dp = _round_up(max(D, 1), 128)
    Xp = jnp.pad(X, ((0, 0), (0, Dp - D)))
    Zp = jnp.pad(Z, ((0, 0), (0, Dp - D)))

    # ---- tiling: ragged grid, no row padding, no output slice --------------
    sub_align = 16 if out_dtype == jnp.bfloat16 else 8
    TN = min(tile_n, _round_up(N, sub_align))
    TM = min(tile_m, _round_up(M, 128))
    grid_n = pl.cdiv(N, TN)
    grid_m = pl.cdiv(M, TM)

    # Grid-axis order: minimize inner-operand re-streaming (inner axis operand
    # is re-fetched once per outer block) and keep the leading parallel axis
    # with >=2 blocks when possible so both v7x TensorCores get work.
    m_major = grid_m * N < grid_n * M
    if m_major and grid_m < 2 and grid_n >= 2:
        m_major = False
    if (not m_major) and grid_n < 2 and grid_m >= 2:
        m_major = True

    if m_major:
        grid = (grid_m, grid_n)
        x_map = lambda j, i: (i, 0)
        z_map = lambda j, i: (j, 0)
        x2_map = lambda j, i: (i, 0)
        z2_map = lambda j, i: (0, j)
        o_map = lambda j, i: (i, j)
    else:
        grid = (grid_n, grid_m)
        x_map = lambda i, j: (i, 0)
        z_map = lambda i, j: (j, 0)
        x2_map = lambda i, j: (i, 0)
        z2_map = lambda i, j: (0, j)
        o_map = lambda i, j: (i, j)

    cost = pl.CostEstimate(
        flops=2 * N * M * Dp,
        transcendentals=N * M,
        bytes_accessed=4 * (N * M + N * Dp + M * Dp),
    )

    out = pl.pallas_call(
        functools.partial(_rbf_tile_kernel, dot_dtype=dot_dtype),
        out_shape=jax.ShapeDtypeStruct((N, M), out_dtype),
        grid=grid,
        in_specs=[
            # scalar offset 2*log_std (or 0): whole array in SMEM
            pl.BlockSpec(memory_space=pltpu.MemorySpace.SMEM),
            # prescaled X row tile
            pl.BlockSpec((TN, Dp), x_map, memory_space=pltpu.MemorySpace.VMEM),
            # prescaled Z row tile
            pl.BlockSpec((TM, Dp), z_map, memory_space=pltpu.MemorySpace.VMEM),
            # x2' column (off - 0.5*||x||^2)
            pl.BlockSpec((TN, 1), x2_map, memory_space=pltpu.MemorySpace.VMEM),
            # z2' row (-0.5*||z||^2)
            pl.BlockSpec((1, TM), z2_map, memory_space=pltpu.MemorySpace.VMEM),
        ],
        out_specs=pl.BlockSpec((TN, TM), o_map,
                               memory_space=pltpu.MemorySpace.VMEM),
        compiler_params=pltpu.CompilerParams(
            dimension_semantics=("parallel", "parallel"),
            vmem_limit_bytes=48 * 1024 * 1024,   # safe on v7x's 64 MiB VMEM
        ),
        cost_estimate=cost,
    )(off2d, Xp, Zp, x2p, z2p)

    return out


def reference_forward(X, Z=None, *, log_std=None, log_ls=None):
    """Pure-JAX reference matching the PyTorch RBFKernel.forward."""
    if Z is None:
        Z = X
    X = X.astype(jnp.float32)
    Z = Z.astype(jnp.float32)
    if log_ls is not None:
        ls = jnp.exp(log_ls.astype(jnp.float32))
        X = X / ls[None, :]
        Z = Z / ls[None, :]
    X2 = jnp.sum(X * X, axis=1, keepdims=True)
    Z2 = jnp.sum(Z * Z, axis=1, keepdims=True)
    XZ = jnp.dot(X, Z.T, precision=jax.lax.Precision.HIGHEST)
    r2 = jnp.clip(X2 - 2.0 * XZ + Z2.T, 0.0, None)
    if log_ls is not None:
        return jnp.exp(2.0 * log_std.astype(jnp.float32) - 0.5 * r2)
    return jnp.exp(-0.5 * r2)


if __name__ == "__main__":
    key = jax.random.PRNGKey(0)
    kx, kz, kls, kstd = jax.random.split(key, 4)

    # Small shapes consistent with the module: X (N, D), Z (M, D).
    N, M, D = 300, 200, 48
    # Scale down so pairwise distances are O(1) and the check is meaningful.
    X = 0.1 * jax.random.normal(kx, (N, D), jnp.float32)
    Z = 0.1 * jax.random.normal(kz, (M, D), jnp.float32)

    tol = dict(atol=2e-5, rtol=2e-5)

    # 1) Default path: parameterize=False, Z defaults to X.
    out_xx = jax.block_until_ready(rbf_forward(X))
    ref_xx = reference_forward(X)
    assert out_xx.shape == (N, N), out_xx.shape
    assert jnp.allclose(out_xx, ref_xx, **tol), "mismatch (X, X)"

    # 2) parameterize=False with explicit Z.
    out_xz = jax.block_until_ready(rbf_forward(X, Z))
    ref_xz = reference_forward(X, Z)
    assert out_xz.shape == (N, M), out_xz.shape
    assert jnp.allclose(out_xz, ref_xz, **tol), "mismatch (X, Z)"

    # 3) parameterize=True path (lengthscales + log_std).
    log_ls = 0.1 * jax.random.normal(kls, (D,), jnp.float32)
    log_std = 0.1 * jax.random.normal(kstd, (1,), jnp.float32)
    out_p = jax.block_until_ready(
        rbf_forward(X, Z, log_std=log_std, log_ls=log_ls))
    ref_p = reference_forward(X, Z, log_std=log_std, log_ls=log_ls)
    assert jnp.allclose(out_p, ref_p, **tol), "mismatch (parameterized)"

    print("KERNEL_OK")
</pallas_src>

<mosaic_0001>
module attributes {stable_mosaic.version = 11 : i64} {
  func.func @_rbf_tile_kernel(%arg0: i32, %arg1: i32, %arg2: memref<1x1xf32, #tpu.memory_space<smem>>, %arg3: memref<304x128xf32, #tpu.memory_space<vmem>>, %arg4: memref<384x128xf32, #tpu.memory_space<vmem>>, %arg5: memref<304x1xf32, #tpu.memory_space<vmem>>, %arg6: memref<1x384xf32, #tpu.memory_space<vmem>>, %arg7: memref<304x384xf32, #tpu.memory_space<vmem>>) attributes {dimension_semantics = [#tpu.dimension_semantics<parallel>, #tpu.dimension_semantics<parallel>], iteration_bounds = array<i64: 1, 1>, scalar_prefetch = 0 : i64, scratch_operands = 0 : i64, tpu.core_type = #tpu.core_type<tc>, window_params = [{transform_indices = @transform_0, window_bounds = array<i64: 1, 1>}, {transform_indices = @transform_1, window_bounds = array<i64: 304, 128>}, {transform_indices = @transform_2, window_bounds = array<i64: 384, 128>}, {transform_indices = @transform_3, window_bounds = array<i64: 304, 1>}, {transform_indices = @transform_4, window_bounds = array<i64: 1, 384>}, {transform_indices = @transform_5, window_bounds = array<i64: 304, 384>}]} {
    %c0 = arith.constant 0 : index
    %c0_0 = arith.constant 0 : index
    %0 = vector.load %arg3[%c0, %c0_0] : memref<304x128xf32, #tpu.memory_space<vmem>>, vector<304x128xf32>
    %c0_1 = arith.constant 0 : index
    %c0_2 = arith.constant 0 : index
    %1 = vector.load %arg4[%c0_1, %c0_2] : memref<384x128xf32, #tpu.memory_space<vmem>>, vector<384x128xf32>
    %cst = arith.constant dense<0.000000e+00> : vector<304x384xf32>
    %2 = tpu.matmul %0, %1, %cst {dimension_numbers = #tpu.dot_dimension_numbers<[1], [1], [0], [0], [0, 0, 1, 0], [], []>} : vector<304x128xf32>, vector<384x128xf32>, vector<304x384xf32> -> vector<304x384xf32>
    %c0_3 = arith.constant 0 : index
    %c0_4 = arith.constant 0 : index
    %3 = vector.load %arg5[%c0_3, %c0_4] : memref<304x1xf32, #tpu.memory_space<vmem>>, vector<304x1xf32>
    %4 = vector.broadcast %3 : vector<304x1xf32> to vector<304x384xf32>
    %5 = arith.addf %2, %4 : vector<304x384xf32>
    %c0_5 = arith.constant 0 : index
    %c0_6 = arith.constant 0 : index
    %6 = vector.load %arg6[%c0_5, %c0_6] : memref<1x384xf32, #tpu.memory_space<vmem>>, vector<1x384xf32>
    %7 = vector.broadcast %6 : vector<1x384xf32> to vector<304x384xf32>
    %8 = arith.addf %5, %7 : vector<304x384xf32>
    %c0_7 = arith.constant 0 : index
    %c0_8 = arith.constant 0 : index
    %9 = memref.load %arg2[%c0_7, %c0_8] : memref<1x1xf32, #tpu.memory_space<smem>>
    %10 = vector.broadcast %9 : f32 to vector<304x384xf32>
    %11 = arith.minimumf %8, %10 : vector<304x384xf32>
    %12 = math.exp %11 : vector<304x384xf32>
    %c0_9 = arith.constant 0 : index
    %c0_10 = arith.constant 0 : index
    %13 = vector.load %arg7[%c0_9, %c0_10] : memref<304x384xf32, #tpu.memory_space<vmem>>, vector<304x384xf32>
    tpu.vector_store %arg7[%c0_9, %c0_10], %12 {strides = array<i32>} : memref<304x384xf32, #tpu.memory_space<vmem>>, vector<304x384xf32>,
    return
  }
  func.func @transform_0(%arg0: i32, %arg1: i32) -> (i32, i32) {
    %c0_i32 = arith.constant 0 : i32
    %c0_i32_0 = arith.constant 0 : i32
    %c0_i32_1 = arith.constant 0 : i32
    return %c0_i32, %c0_i32_0 : i32, i32
  }
  func.func @transform_1(%arg0: i32, %arg1: i32) -> (i32, i32) {
    %c0_i32 = arith.constant 0 : i32
    %c0_i32_0 = arith.constant 0 : i32
    return %arg0, %c0_i32 : i32, i32
  }
  func.func @transform_2(%arg0: i32, %arg1: i32) -> (i32, i32) {
    %c0_i32 = arith.constant 0 : i32
    %c0_i32_0 = arith.constant 0 : i32
    return %arg1, %c0_i32 : i32, i32
  }
  func.func @transform_3(%arg0: i32, %arg1: i32) -> (i32, i32) {
    %c0_i32 = arith.constant 0 : i32
    %c0_i32_0 = arith.constant 0 : i32
    return %arg0, %c0_i32 : i32, i32
  }
  func.func @transform_4(%arg0: i32, %arg1: i32) -> (i32, i32) {
    %c0_i32 = arith.constant 0 : i32
    %c0_i32_0 = arith.constant 0 : i32
    return %c0_i32, %arg1 : i32, i32
  }
  func.func @transform_5(%arg0: i32, %arg1: i32) -> (i32, i32) {
    %c0_i32 = arith.constant 0 : i32
    return %arg0, %arg1 : i32, i32
  }
}

</mosaic_0001>

<bundles_post_ra>
// kernel: tpu_custom_call.1
= control target key start
LH: loop header
LB: loop body
LE: loop exit
PB: predicated region body
PF: predicated region fallthrough
CT: control target
= control target key end

     0   :  { %11 = vsyncpa [#allocation4], 0  ;;  %s2558_s0 = inlined_call_operand.<no memory space> [shape: f32[1,1], index: 0, kind: input, shape index: {}]   ;;  %s2559_s1 = inlined_call_operand.vmem [shape: f32[300,128], index: 1, kind: input, shape index: {}]   ;;  %s2560_s2 = inlined_call_operand.hbm [shape: f32[300,128], index: 2, kind: input, shape index: {}]   ;;  %s2561_s3 = inlined_call_operand.vmem [shape: f32[300,1], index: 3, kind: input, shape index: {}]   ;;  %s2562_s4 = inlined_call_operand.vmem [shape: f32[1,300], index: 4, kind: input, shape index: {}]   ;;  %s2563_s5 = inlined_call_operand.hbm [shape: f32[300,300], index: 5, kind: output, shape index: {}]  }
   0x1   :  { %12 = vsyncpa [#allocation5], 0 }
   0x2   :  { %20 = vsyncadd [#allocation4], 1280  ;;  %s21_s20 = sshll.u32 %s2560_s2, 4  ;;  %s1682_s21 = smov [#allocation3]   ;;  %s22_s20 = int_to_ptr.hbm [resolvable:$true] %s21_s20 }
   0x3   :  { %s23_s22 = sshll.u32 %s1682_s21, 4  ;;  %s1683_s23 = smov 128   ;;  %s24_s22 = int_to_ptr.vmem [resolvable:$true] %s23_s22 }
   0x4   :  { %s1684_s24 = smov 8  }
   0x5   :  { %29 = dma.hbm_to_vmem [thread:$0]  %s22_s20, 4864, %s24_s22, [#allocation4], %s1683_s23, %s1683_s23, %s1684_s24  }
   0x6   :  { %1678 = dma.done.wait [#allocation4], 6144  }
   0x7   :  { %1679 = vsyncadd [#allocation4], 4294961152  ;;  %v1685_v0 = vmov 0   ;;  %v91_v1 = vld [vmem:[#allocation3 + $0x78] sm:$0xff]  ;;  %v90_v4 = vld [vmem:[#allocation3 + $0x70] sm:$0xff]  ;;  %s1331_s24 = sshll.u32 %s2563_s5, 4  ;;  %s1332_s24 = int_to_ptr.hbm [resolvable:$true] %s1331_s24 }
   0x8   :  { %1399 = vset.pattern.permute.xlu0 %v1685_v0  ;;  %1400 = vset.pattern.permute.xlu1 %v1685_v0  ;;  %v1722_v2 = vld [vmem:[#allocation3 + $0xf8] sm:$0xff]  ;;  %v1728_v5 = vld [vmem:[#allocation3 + $0xf0] sm:$0xff]  ;;  %v89_v7 = vld [vmem:[#allocation3 + $0x68] sm:$0xff] }
   0x9   :  { %1401 = vset.pattern.permute.xlu2 %v1685_v0  ;;  %v1724_v3 = vld [vmem:[#allocation3 + $0x178] sm:$0xff]  ;;  %352 = vmatpush.xpose.msra.mxu0 %v91_v1  ;;  %v1730_v6 = vld [vmem:[#allocation3 + $0x170] sm:$0xff]  ;;  %v124_v8 = vld [vmem:[%s2561_s3] sm:$0xff] }
   0xa   :  { %1344 = vmatpush.xpose.msra.mxu3 %v91_v1  ;;  %483 = vmatpush.xpose.msra.mxu1 %v1722_v2  ;;  %v1737_v9 = vld [vmem:[#allocation3 + $0xe8] sm:$0xff]  ;;  %v126_v11 = vld [vmem:[%s2561_s3 + $0x10] sm:$0xff]  ;;  %v88_v12 = vld [vmem:[#allocation3 + $0x60] sm:$0xff] }
   0xb   :  { %614 = vmatpush.xpose.msra.mxu2 %v1724_v3  ;;  %v1739_v10 = vld [vmem:[#allocation3 + $0x168] sm:$0xff]  ;;  %164 = vperm.xlu0 %1399, %v124_v8   ;;  %v1746_v13 = vld [vmem:[#allocation3 + $0xe0] sm:$0xff]  ;;  %v87_v16 = vld [vmem:[#allocation3 + $0x58] sm:$0xff] }
   0xc   :  { %v1748_v14 = vld [vmem:[#allocation3 + $0x160] sm:$0xff]  ;;  %174 = vperm.xlu1 %1400, %v126_v11   ;;  %v125_v15 = vld [vmem:[%s2561_s3 + $0x8] sm:$0xff]  ;;  %v1758_v18 = vld [vmem:[#allocation3 + $0xd8] sm:$0xff] }
   0xd   :  { %353 = vmatpush.xpose.msra.mxu0 %v90_v4  ;;  %v128_v17 = vld [vmem:[%s2561_s3 + $0x20] sm:$0xff]  ;;  %v1760_v19 = vld [vmem:[#allocation3 + $0x158] sm:$0xff]  ;;  %v86_v21 = vld [vmem:[#allocation3 + $0x50] sm:$0xff] }
   0xe   :  { %1345 = vmatpush.xpose.msra.mxu3 %v90_v4  ;;  %484 = vmatpush.xpose.msra.mxu1 %v1728_v5  ;;  %v127_v20 = vld [vmem:[%s2561_s3 + $0x18] sm:$0xff]  ;;  %v1767_v22 = vld [vmem:[#allocation3 + $0xd0] sm:$0xff]  ;;  %v85_v25 = vld [vmem:[#allocation3 + $0x48] sm:$0xff] }
   0xf   :  { %615 = vmatpush.xpose.msra.mxu2 %v1730_v6  ;;  %184 = vperm.xlu2 %1401, %v128_v17   ;;  %v1769_v23 = vld [vmem:[#allocation3 + $0x150] sm:$0xff]  ;;  %v129_v26 = vld [vmem:[%s2561_s3 + $0x28] sm:$0xff]  ;;  %v131_v29 = vld [vmem:[%s2561_s3 + $0x38] sm:$0xff] }
  0x10   :  { %v130_v24 = vld [vmem:[%s2561_s3 + $0x30] sm:$0xff]  ;;  %v1779_v27 = vld [vmem:[#allocation3 + $0xc8] sm:$0xff]  ;;  %v84_v30 = vld [vmem:[#allocation3 + $0x40] sm:$0xff] }
  0x11   :  { %354 = vmatpush.xpose.msra.mxu0 %v89_v7  ;;  %v1781_v28 = vld [vmem:[#allocation3 + $0x148] sm:$0xff]  ;;  %v1788_v31 = vld [vmem:[#allocation3 + $0xc0] sm:$0xff]  ;;  %v83_v34 = vld [vmem:[#allocation3 + $0x38] sm:$0xff] }
  0x12   :  { %1346 = vmatpush.xpose.msra.mxu3 %v89_v7  ;;  %485 = vmatpush.xpose.msra.mxu1 %v1737_v9  ;;  %v1790_v32 = vld [vmem:[#allocation3 + $0x140] sm:$0xff]  ;;  %v133_v33 = vld [vmem:[%s2561_s3 + $0x48] sm:$0xff]  ;;  %v1797_v35 = vld [vmem:[#allocation3 + $0xb8] sm:$0xff] }
  0x13   :  { %616 = vmatpush.xpose.msra.mxu2 %v1739_v10  ;;  %169 = vperm.xlu0 %1399, %v125_v15   ;;  %v1799_v36 = vld [vmem:[#allocation3 + $0x138] sm:$0xff]  ;;  %v134_v37 = vld [vmem:[%s2561_s3 + $0x50] sm:$0xff]  ;;  %v132_v38 = vld [vmem:[%s2561_s3 + $0x40] sm:$0xff] }
  0x14   :  { %179 = vperm.xlu1 %1400, %v127_v20   ;;  %v82_v39 = vld [vmem:[#allocation3 + $0x30] sm:$0xff]  ;;  %v136_v42 = vld [vmem:[%s2561_s3 + $0x60] sm:$0xff]  ;;  %v81_v43 = vld [vmem:[#allocation3 + $0x28] sm:$0xff] }
  0x15   :  { %355 = vmatpush.xpose.msra.mxu0 %v88_v12  ;;  %v1809_v40 = vld [vmem:[#allocation3 + $0xb0] sm:$0xff]  ;;  %v1818_v44 = vld [vmem:[#allocation3 + $0xa8] sm:$0xff]  ;;  %v135_v47 = vld [vmem:[%s2561_s3 + $0x58] sm:$0xff] }
  0x16   :  { %1347 = vmatpush.xpose.msra.mxu3 %v88_v12  ;;  %486 = vmatpush.xpose.msra.mxu1 %v1746_v13  ;;  %v1811_v41 = vld [vmem:[#allocation3 + $0x130] sm:$0xff]  ;;  %v1820_v45 = vld [vmem:[#allocation3 + $0x128] sm:$0xff]  ;;  %v80_v48 = vld [vmem:[#allocation3 + $0x20] sm:$0xff] }
  0x17   :  { %617 = vmatpush.xpose.msra.mxu2 %v1748_v14  ;;  %189 = vperm.xlu2 %1401, %v129_v26   ;;  %v137_v46 = vld [vmem:[%s2561_s3 + $0x68] sm:$0xff]  ;;  %v1830_v49 = vld [vmem:[#allocation3 + $0xa0] sm:$0xff]  ;;  %v139_v51 = vld [vmem:[%s2561_s3 + $0x78] sm:$0xff] }
  0x18   :  { %v1832_v50 = vld [vmem:[#allocation3 + $0x120] sm:$0xff]  ;;  %v79_v52 = vld [vmem:[#allocation3 + $0x18] sm:$0xff]  ;;  %v138_v56 = vld [vmem:[%s2561_s3 + $0x70] sm:$0xff] }
  0x19   :  { %356 = vmatpush.xpose.msra.mxu0 %v87_v16  ;;  %v1839_v53 = vld [vmem:[#allocation3 + $0x98] sm:$0xff]  ;;  %v140_v55 = vld [vmem:[%s2561_s3 + $0x80] sm:$0xff]  ;;  %v78_v57 = vld [vmem:[#allocation3 + $0x10] sm:$0xff] }
  0x1a   :  { %1348 = vmatpush.xpose.msra.mxu3 %v87_v16  ;;  %487 = vmatpush.xpose.msra.mxu1 %v1758_v18  ;;  %v1841_v54 = vld [vmem:[#allocation3 + $0x118] sm:$0xff]  ;;  %v1851_v58 = vld [vmem:[#allocation3 + $0x90] sm:$0xff]  ;;  %v77_v61 = vld [vmem:[#allocation3 + $0x8] sm:$0xff] }
  0x1b   :  { %618 = vmatpush.xpose.msra.mxu2 %v1760_v19  ;;  %194 = vperm.xlu0 %1399, %v130_v24   ;;  %v1853_v59 = vld [vmem:[#allocation3 + $0x110] sm:$0xff]  ;;  %v1860_v62 = vld [vmem:[#allocation3 + $0x88] sm:$0xff]  ;;  %v143_v0 = vld [vmem:[%s2561_s3 + $0x98] sm:$0xff] }
  0x1c   :  { %199 = vperm.xlu1 %1400, %v131_v29   ;;  %v142_v60 = vld [vmem:[%s2561_s3 + $0x90] sm:$0xff]  ;;  %v1862_v63 = vld [vmem:[#allocation3 + $0x108] sm:$0xff]  ;;  %v76_v4 = vld [vmem:[#allocation3] sm:$0xff] }
  0x1d   :  { %357 = vmatpush.xpose.msra.mxu0 %v86_v21  ;;  %v141_v1 = vld [vmem:[%s2561_s3 + $0x88] sm:$0xff]  ;;  %v1872_v7 = vld [vmem:[#allocation3 + $0x80] sm:$0xff]  ;;  %v146_v16 = vld [vmem:[%s2561_s3 + $0xb0] sm:$0xff] }
  0x1e   :  { %1349 = vmatpush.xpose.msra.mxu3 %v86_v21  ;;  %488 = vmatpush.xpose.msra.mxu1 %v1767_v22  ;;  %v1874_v8 = vld [vmem:[#allocation3 + $0x100] sm:$0xff]  ;;  %v145_v11 = vld [vmem:[%s2561_s3 + $0xa8] sm:$0xff]  ;;  %v1907_v21 = vld [vmem:[%s2559_s1 + $0xf0] sm:$0xff] }
  0x1f   :  { %619 = vmatpush.xpose.msra.mxu2 %v1769_v23  ;;  %204 = vperm.xlu2 %1401, %v132_v38   ;;  %v38_v12 = vld [vmem:[%s2559_s1] sm:$0xff]  ;;  %v1885_v15 = vld [vmem:[%s2559_s1 + $0xe8] sm:$0xff]  ;;  %v147_v24 = vld [vmem:[%s2561_s3 + $0xb8] sm:$0xff] }
  0x20   :  { %v144_v17 = vld [vmem:[%s2561_s3 + $0xa0] sm:$0xff]  ;;  %v39_v20 = vld [vmem:[%s2559_s1 + $0x8] sm:$0xff]  ;;  %v1927_v26 = vld [vmem:[%s2559_s1 + $0xf8] sm:$0xff] }
  0x21   :  { %358 = vmatpush.xpose.msra.mxu0 %v85_v25  ;;  %v150_v29 = vld [vmem:[%s2561_s3 + $0xd0] sm:$0xff]  ;;  %v43_v38 = vld [vmem:[%s2559_s1 + $0x28] sm:$0xff] }
  0x22   :  { %1350 = vmatpush.xpose.msra.mxu3 %v85_v25  ;;  %489 = vmatpush.xpose.msra.mxu1 %v1779_v27  ;;  %v40_v25 = vld [vmem:[%s2559_s1 + $0x10] sm:$0xff] }
  0x23   :  { %620 = vmatpush.xpose.msra.mxu2 %v1781_v28  ;;  %209 = vperm.xlu0 %1399, %v133_v33   ;;  %v1947_v33 = vld [vmem:[%s2559_s1 + $0x100] sm:$0xff] }
  0x24   :  { %214 = vperm.xlu1 %1400, %v134_v37   ;;  %v1964_v37 = vld [vmem:[%s2559_s1 + $0x108] sm:$0xff] }
  0x25   :  { %359 = vmatpush.xpose.msra.mxu0 %v84_v30 }
  0x26   :  { %1351 = vmatpush.xpose.msra.mxu3 %v84_v30  ;;  %490 = vmatpush.xpose.msra.mxu1 %v1788_v31  ;;  %v41_v30 = vld [vmem:[%s2559_s1 + $0x18] sm:$0xff] }
  0x27   :  { %621 = vmatpush.xpose.msra.mxu2 %v1790_v32  ;;  %219 = vperm.xlu2 %1401, %v135_v47   ;;  %v45_v47 = vld [vmem:[%s2559_s1 + $0x38] sm:$0xff] }
  0x29   :  { %360 = vmatpush.xpose.msra.mxu0 %v83_v34 }
  0x2a   :  { %1352 = vmatpush.xpose.msra.mxu3 %v83_v34  ;;  %491 = vmatpush.xpose.msra.mxu1 %v1797_v35  ;;  %v153_v34 = vld [vmem:[%s2561_s3 + $0xe8] sm:$0xff] }
  0x2b   :  { %622 = vmatpush.xpose.msra.mxu2 %v1799_v36  ;;  %224 = vperm.xlu0 %1399, %v136_v42   ;;  %v44_v42 = vld [vmem:[%s2559_s1 + $0x30] sm:$0xff] }
  0x2c   :  { %229 = vperm.xlu1 %1400, %v137_v46  }
  0x2d   :  { %361 = vmatpush.xpose.msra.mxu0 %v82_v39 }
  0x2e   :  { %1353 = vmatpush.xpose.msra.mxu3 %v82_v39  ;;  %492 = vmatpush.xpose.msra.mxu1 %v1809_v40  ;;  %v158_v39 = vld [vmem:[%s2561_s3 + $0x110] sm:$0xff] }
  0x2f   :  { %623 = vmatpush.xpose.msra.mxu2 %v1811_v41  ;;  %234 = vperm.xlu2 %1401, %v138_v56  }
  0x31   :  { %362 = vmatpush.xpose.msra.mxu0 %v81_v43 }
  0x32   :  { %1354 = vmatpush.xpose.msra.mxu3 %v81_v43  ;;  %493 = vmatpush.xpose.msra.mxu1 %v1818_v44  ;;  %v1994_v43 = vld [vmem:[%s2559_s1 + $0x118] sm:$0xff] }
  0x33   :  { %624 = vmatpush.xpose.msra.mxu2 %v1820_v45  ;;  %239 = vperm.xlu0 %1399, %v139_v51   ;;  %v160_v51 = vld [vmem:[%s2561_s3 + $0x120] sm:$0xff] }
  0x34   :  { %244 = vperm.xlu1 %1400, %v140_v55  }
  0x35   :  { %363 = vmatpush.xpose.msra.mxu0 %v80_v48 }
  0x36   :  { %1355 = vmatpush.xpose.msra.mxu3 %v80_v48  ;;  %494 = vmatpush.xpose.msra.mxu1 %v1830_v49  ;;  %v2010_v48 = vld [vmem:[%s2559_s1 + $0x120] sm:$0xff] }
  0x37   :  { %625 = vmatpush.xpose.msra.mxu2 %v1832_v50  ;;  %249 = vperm.xlu2 %1401, %v141_v1  }
  0x39   :  { %364 = vmatpush.xpose.msra.mxu0 %v79_v52 }
  0x3a   :  { %1356 = vmatpush.xpose.msra.mxu3 %v79_v52  ;;  %495 = vmatpush.xpose.msra.mxu1 %v1839_v53  ;;  %v46_v52 = vld [vmem:[%s2559_s1 + $0x40] sm:$0xff] }
  0x3b   :  { %626 = vmatpush.xpose.msra.mxu2 %v1841_v54  ;;  %254 = vperm.xlu0 %1399, %v142_v60  }
  0x3c   :  { %259 = vperm.xlu1 %1400, %v143_v0   ;;  %v48_v0 = vld [vmem:[%s2559_s1 + $0x50] sm:$0xff] }
  0x3d   :  { %365 = vmatpush.xpose.msra.mxu0 %v78_v57 }
  0x3e   :  { %1357 = vmatpush.xpose.msra.mxu3 %v78_v57  ;;  %496 = vmatpush.xpose.msra.mxu1 %v1851_v58 }
  0x3f   :  { %627 = vmatpush.xpose.msra.mxu2 %v1853_v59  ;;  %264 = vperm.xlu2 %1401, %v144_v17  }
  0x41   :  { %366 = vmatpush.xpose.msra.mxu0 %v77_v61 }
  0x42   :  { %1358 = vmatpush.xpose.msra.mxu3 %v77_v61  ;;  %497 = vmatpush.xpose.msra.mxu1 %v1860_v62 }
  0x43   :  { %628 = vmatpush.xpose.msra.mxu2 %v1862_v63  ;;  %269 = vperm.xlu0 %1399, %v145_v11  }
  0x44   :  { %274 = vperm.xlu1 %1400, %v146_v16  }
  0x45   :  { %367 = vmatpush.xpose.msra.mxu0 %v76_v4 }
  0x46   :  { %1359 = vmatpush.xpose.msra.mxu3 %v76_v4  ;;  %498 = vmatpush.xpose.msra.mxu1 %v1872_v7 }
  0x47   :  { %629 = vmatpush.xpose.msra.mxu2 %v1874_v8  ;;  %279 = vperm.xlu2 %1401, %v147_v24  }
  0x48   :  { %368 = vmatmul.f32.vlgmr.msra.gmra.mxu0 %v38_v12 }
  0x49   :  { %455 = vmatmul.f32.vlgmr.msra.gmra.mxu3 %v1885_v15  ;;  %499 = vmatmul.f32.vlgmr.msra.gmra.mxu1 %v38_v12 }
  0x4a   :  { %1360 = vmatpush.xpose.msrb.mxu3 %v1722_v2  ;;  %630 = vmatmul.f32.vlgmr.msra.gmra.mxu2 %v38_v12  ;;  %v148_v2 = vld [vmem:[%s2561_s3 + $0xc0] sm:$0xff] }
  0x4b   :  { %284 = vperm.xlu0 %1399, %v148_v2  }
  0x4e   :  { %1361 = vmatpush.xpose.msrb.mxu3 %v1728_v5  ;;  %v149_v5 = vld [vmem:[%s2561_s3 + $0xc8] sm:$0xff] }
  0x4f   :  { %289 = vperm.xlu1 %1400, %v149_v5   ;;  %294 = vperm.xlu2 %1401, %v150_v29  }
  0x50   :  { %371 = vmatmul.f32.gmra.mxu0 %v39_v20 }
  0x51   :  { %458 = vmatmul.f32.gmra.mxu3 %v1907_v21  ;;  %502 = vmatmul.f32.gmra.mxu1 %v39_v20 }
  0x52   :  { %1362 = vmatpush.xpose.msrb.mxu3 %v1737_v9  ;;  %633 = vmatmul.f32.gmra.mxu2 %v39_v20  ;;  %v151_v9 = vld [vmem:[%s2561_s3 + $0xd8] sm:$0xff] }
  0x53   :  { %299 = vperm.xlu0 %1399, %v151_v9  }
  0x56   :  { %1363 = vmatpush.xpose.msrb.mxu3 %v1746_v13  ;;  %v152_v13 = vld [vmem:[%s2561_s3 + $0xe0] sm:$0xff] }
  0x57   :  { %304 = vperm.xlu1 %1400, %v152_v13   ;;  %309 = vperm.xlu2 %1401, %v153_v34  }
  0x58   :  { %374 = vmatmul.f32.gmra.mxu0 %v40_v25 }
  0x59   :  { %461 = vmatmul.f32.gmra.mxu3 %v1927_v26  ;;  %505 = vmatmul.f32.gmra.mxu1 %v40_v25 }
  0x5a   :  { %1364 = vmatpush.xpose.msrb.mxu3 %v1758_v18  ;;  %636 = vmatmul.f32.gmra.mxu2 %v40_v25  ;;  %v154_v18 = vld [vmem:[%s2561_s3 + $0xf0] sm:$0xff] }
  0x5b   :  { %314 = vperm.xlu0 %1399, %v154_v18  }
  0x5e   :  { %1365 = vmatpush.xpose.msrb.mxu3 %v1767_v22  ;;  %v155_v22 = vld [vmem:[%s2561_s3 + $0xf8] sm:$0xff] }
  0x5f   :  { %319 = vperm.xlu1 %1400, %v155_v22   ;;  %v2141_v22 = vstv %s2558_s0  ;;  %s1688_s0 = smov 24  }
  0x60   :  { %377 = vmatmul.f32.gmra.mxu0 %v41_v30 }
  0x61   :  { %464 = vmatmul.f32.gmra.mxu3 %v1947_v33  ;;  %508 = vmatmul.f32.gmra.mxu1 %v41_v30 }
  0x62   :  { %1366 = vmatpush.xpose.msrb.mxu3 %v1779_v27  ;;  %639 = vmatmul.f32.gmra.mxu2 %v41_v30  ;;  %v42_v27 = vld [vmem:[%s2559_s1 + $0x20] sm:$0xff] }
  0x66   :  { %1367 = vmatpush.xpose.msrb.mxu3 %v1788_v31  ;;  %v157_v31 = vld [vmem:[%s2561_s3 + $0x108] sm:$0xff] }
  0x67   :  { %329 = vperm.xlu0 %1399, %v157_v31   ;;  %334 = vperm.xlu1 %1400, %v158_v39  }
  0x68   :  { %380 = vmatmul.f32.gmra.mxu0 %v42_v27 }
  0x69   :  { %467 = vmatmul.f32.gmra.mxu3 %v1964_v37  ;;  %511 = vmatmul.f32.gmra.mxu1 %v42_v27 }
  0x6a   :  { %1368 = vmatpush.xpose.msrb.mxu3 %v1797_v35  ;;  %642 = vmatmul.f32.gmra.mxu2 %v42_v27  ;;  %v1978_v35 = vld [vmem:[%s2559_s1 + $0x110] sm:$0xff] }
  0x6e   :  { %1369 = vmatpush.xpose.msrb.mxu3 %v1809_v40  ;;  %v1985_v40 = vpop.permute.xlu2 %184 }
  0x6f   :  { %344 = vperm.xlu0 %1399, %v160_v51  }
  0x70   :  { %383 = vmatmul.f32.gmra.mxu0 %v43_v38 }
  0x71   :  { %470 = vmatmul.f32.gmra.mxu3 %v1978_v35  ;;  %514 = vmatmul.f32.gmra.mxu1 %v43_v38 }
  0x72   :  { %1370 = vmatpush.xpose.msrb.mxu3 %v1818_v44  ;;  %645 = vmatmul.f32.gmra.mxu2 %v43_v38  ;;  %v156_v44 = vld [vmem:[%s2561_s3 + $0x100] sm:$0xff] }
  0x73   :  { %324 = vperm.xlu2 %1401, %v156_v44  }
  0x76   :  { %1371 = vmatpush.xpose.msrb.mxu3 %v1830_v49  ;;  %v2002_v46 = vpop.permute.xlu2 %189 }
  0x78   :  { %386 = vmatmul.f32.gmra.mxu0 %v44_v42 }
  0x79   :  { %473 = vmatmul.f32.gmra.mxu3 %v1994_v43  ;;  %517 = vmatmul.f32.gmra.mxu1 %v44_v42 }
  0x7a   :  { %1372 = vmatpush.xpose.msrb.mxu3 %v1839_v53  ;;  %648 = vmatmul.f32.gmra.mxu2 %v44_v42  ;;  %v2027_v53 = vld [vmem:[%s2559_s1 + $0x128] sm:$0xff] }
  0x7d   :  { %v2014_v49 = vpop.permute.xlu0 %164 }
  0x7e   :  { %1373 = vmatpush.xpose.msrb.mxu3 %v1851_v58  ;;  %v2029_v55 = vpop.permute.xlu1 %174  ;;  %v2031_v56 = vpop.permute.xlu2 %204  ;;  %v47_v58 = vld [vmem:[%s2559_s1 + $0x48] sm:$0xff] }
  0x80   :  { %389 = vmatmul.f32.gmra.mxu0 %v45_v47 }
  0x81   :  { %476 = vmatmul.f32.gmra.mxu3 %v2010_v48  ;;  %520 = vmatmul.f32.gmra.mxu1 %v45_v47 }
  0x82   :  { %1374 = vmatpush.xpose.msrb.mxu3 %v1860_v62  ;;  %651 = vmatmul.f32.gmra.mxu2 %v45_v47 }
  0x85   :  { %v2034_v57 = vpop.permute.xlu0 %169 }
  0x86   :  { %1375 = vmatpush.xpose.msrb.mxu3 %v1872_v7  ;;  %v2043_v60 = vpop.permute.xlu1 %179  ;;  %v2045_v61 = vpop.permute.xlu2 %219 }
  0x88   :  { %392 = vmatmul.f32.gmra.mxu0 %v46_v52 }
  0x89   :  { %479 = vmatmul.f32.gmra.mxu3 %v2027_v53  ;;  %523 = vmatmul.f32.gmra.mxu1 %v46_v52 }
  0x8a   :  { %1376 = vmatpush.xpose.msra.mxu3 %v1724_v3  ;;  %654 = vmatmul.f32.gmra.mxu2 %v46_v52  ;;  %v161_v3 = vld [vmem:[%s2561_s3 + $0x128] sm:$0xff] }
  0x8b   :  { %349 = vperm.xlu1 %1400, %v161_v3  }
  0x8d   :  { %v2049_v62 = vpop.permute.xlu0 %194 }
  0x8e   :  { %1377 = vmatpush.xpose.msra.mxu3 %v1730_v6  ;;  %v159_v6 = vld [vmem:[%s2561_s3 + $0x118] sm:$0xff]  ;;  %v2058_v1 = vpop.permute.xlu1 %199 }
  0x8f   :  { %339 = vperm.xlu2 %1401, %v159_v6  }
  0x90   :  { %395 = vmatmul.f32.gmra.mxu0 %v47_v58 }
  0x91   :  { %586 = vmatmul.f32.vlgmr.msrb.gmra.mxu3 %v1885_v15  ;;  %526 = vmatmul.f32.gmra.mxu1 %v47_v58 }
  0x92   :  { %1378 = vmatpush.xpose.msra.mxu3 %v1739_v10  ;;  %657 = vmatmul.f32.gmra.mxu2 %v47_v58  ;;  %v2061_v10 = vpop.permute.xlu2 %234 }
  0x95   :  { %v2064_v4 = vpop.permute.xlu0 %209 }
  0x96   :  { %1379 = vmatpush.xpose.msra.mxu3 %v1748_v14  ;;  %v49_v14 = vld [vmem:[%s2559_s1 + $0x58] sm:$0xff]  ;;  %v2070_v7 = vpop.permute.xlu1 %214 }
  0x98   :  { %398 = vmatmul.f32.gmra.mxu0 %v48_v0 }
  0x99   :  { %589 = vmatmul.f32.gmra.mxu3 %v1907_v21  ;;  %529 = vmatmul.f32.gmra.mxu1 %v48_v0 }
  0x9a   :  { %1380 = vmatpush.xpose.msra.mxu3 %v1760_v19  ;;  %660 = vmatmul.f32.gmra.mxu2 %v48_v0  ;;  %v2076_v11 = vpop.permute.xlu2 %249 }
  0x9d   :  { %v2074_v19 = vpop.permute.xlu0 %224 }
  0x9e   :  { %1381 = vmatpush.xpose.msra.mxu3 %v1769_v23  ;;  %v50_v23 = vld [vmem:[%s2559_s1 + $0x60] sm:$0xff]  ;;  %v2082_v12 = vpop.permute.xlu1 %229 }
  0xa0   :  { %401 = vmatmul.f32.gmra.mxu0 %v49_v14 }
  0xa1   :  { %592 = vmatmul.f32.gmra.mxu3 %v1927_v26  ;;  %532 = vmatmul.f32.gmra.mxu1 %v49_v14 }
  0xa2   :  { %1382 = vmatpush.xpose.msra.mxu3 %v1781_v28  ;;  %663 = vmatmul.f32.gmra.mxu2 %v49_v14  ;;  %v2089_v16 = vpop.permute.xlu2 %264  ;;  %v55_v14 = vld [vmem:[%s2559_s1 + $0x88] sm:$0xff] }
  0xa5   :  { %v2086_v28 = vpop.permute.xlu0 %239 }
  0xa6   :  { %1383 = vmatpush.xpose.msra.mxu3 %v1790_v32  ;;  %v51_v32 = vld [vmem:[%s2559_s1 + $0x68] sm:$0xff]  ;;  %v2094_v17 = vpop.permute.xlu1 %244 }
  0xa8   :  { %404 = vmatmul.f32.gmra.mxu0 %v50_v23 }
  0xa9   :  { %595 = vmatmul.f32.gmra.mxu3 %v1947_v33  ;;  %535 = vmatmul.f32.gmra.mxu1 %v50_v23 }
  0xaa   :  { %1384 = vmatpush.xpose.msra.mxu3 %v1799_v36  ;;  %666 = vmatmul.f32.gmra.mxu2 %v50_v23  ;;  %v2104_v2 = vpop.permute.xlu2 %279 }
  0xad   :  { %v2098_v36 = vpop.permute.xlu0 %254 }
  0xae   :  { %1385 = vmatpush.xpose.msra.mxu3 %v1811_v41  ;;  %v52_v41 = vld [vmem:[%s2559_s1 + $0x70] sm:$0xff]  ;;  %v2106_v20 = vpop.permute.xlu1 %259 }
  0xb0   :  { %407 = vmatmul.f32.gmra.mxu0 %v51_v32 }
  0xb1   :  { %598 = vmatmul.f32.gmra.mxu3 %v1964_v37  ;;  %538 = vmatmul.f32.gmra.mxu1 %v51_v32 }
  0xb2   :  { %1386 = vmatpush.xpose.msra.mxu3 %v1820_v45  ;;  %669 = vmatmul.f32.gmra.mxu2 %v51_v32  ;;  %v2119_v24 = vpop.permute.xlu2 %294 }
  0xb5   :  { %v2110_v45 = vpop.permute.xlu0 %269 }
  0xb6   :  { %1387 = vmatpush.xpose.msra.mxu3 %v1832_v50  ;;  %v53_v50 = vld [vmem:[%s2559_s1 + $0x78] sm:$0xff]  ;;  %v2116_v5 = vpop.permute.xlu1 %274 }
  0xb8   :  { %410 = vmatmul.f32.gmra.mxu0 %v52_v41 }
  0xb9   :  { %601 = vmatmul.f32.gmra.mxu3 %v1978_v35  ;;  %541 = vmatmul.f32.gmra.mxu1 %v52_v41 }
  0xba   :  { %1388 = vmatpush.xpose.msra.mxu3 %v1841_v54  ;;  %672 = vmatmul.f32.gmra.mxu2 %v52_v41  ;;  %v745_v54 = vld [vmem:[%s2562_s4] sm:$0x7]  ;;  %v2147_v31 = vpop.permute.xlu2 %309  ;;  %s1687_s4 = smov 384  }
  0xbb   :  { %v2128_v9 = vperm.slane %v745_v54, 0  ;;  %v2130_v13 = vperm.slane %v745_v54, 1  ;;  %v2153_v47 = vperm.slane %v745_v54, 2 }
  0xbe   :  { %1389 = vmatpush.xpose.msra.mxu3 %v1853_v59  ;;  %v2125_v59 = vpop.permute.xlu0 %284 }
  0xc0   :  { %413 = vmatmul.f32.gmra.mxu0 %v53_v50 }
  0xc1   :  { %604 = vmatmul.f32.gmra.mxu3 %v1994_v43  ;;  %544 = vmatmul.f32.gmra.mxu1 %v53_v50  ;;  %v2135_v29 = vpop.permute.xlu1 %289 }
  0xc2   :  { %1390 = vmatpush.xpose.msra.mxu3 %v1862_v63  ;;  %675 = vmatmul.f32.gmra.mxu2 %v53_v50  ;;  %v54_v63 = vld [vmem:[%s2559_s1 + $0x80] sm:$0xff] }
  0xc5   :  { %v369_v25 = vpop.f32.mrf.mxu0 }
  0xc6   :  { %1391 = vmatpush.xpose.msra.mxu3 %v1874_v8  ;;  %v370_v18 = vadd.f32 %v369_v25, %v2014_v49  ;;  %v500_v30 = vpop.f32.mrf.mxu1  ;;  %v2149_v38 = vpop.permute.xlu0 %299 }
  0xc7   :  { %v501_v8 = vadd.f32 %v500_v30, %v2014_v49 }
  0xc8   :  { %v753_v34 = vadd.f32 %v2128_v9, %v370_v18  ;;  %416 = vmatmul.f32.gmra.mxu0 %v54_v63 }
  0xc9   :  { %607 = vmatmul.f32.gmra.mxu3 %v2010_v48  ;;  %v754_v27 = vadd.f32 %v2130_v13, %v501_v8  ;;  %547 = vmatmul.f32.gmra.mxu1 %v54_v63  ;;  %v2164_v25 = vpop.permute.xlu1 %304 }
  0xca   :  { %678 = vmatmul.f32.gmra.mxu2 %v54_v63  ;;  %v869_v39 = vmin.f32 %v753_v34, %v2141_v22 }
  0xcb   :  { %v870_v42 = vmin.f32 %v754_v27, %v2141_v22 }
  0xcc   :  { %v456_v44 = vpop.f32.mrf.mxu3  ;;  %v983_v51 = vmul.f32 1.442695, %v869_v39 }
  0xcd   :  { %v631_v52 = vpop.f32.mrf.mxu2  ;;  %v457_v3 = vadd.f32 %v456_v44, %v2147_v31  ;;  %v985_v58 = vmul.f32 1.442695, %v870_v42  ;;  %v372_v0 = vpop.f32.mrf.mxu0 }
  0xce   :  { %v632_v6 = vadd.f32 %v631_v52, %v2014_v49  ;;  %1402 = vpow2.f32 %v983_v51  ;;  %v373_v23 = vadd.f32 %v372_v0, %v2034_v57  ;;  %v503_v32 = vpop.f32.mrf.mxu1  ;;  %v2171_v8 = vpop.permute.xlu0 %314 }
  0xcf   :  { %v840_v41 = vadd.f32 %v2128_v9, %v457_v3  ;;  %1404 = vpow2.f32 %v985_v58  ;;  %v504_v54 = vadd.f32 %v503_v32, %v2034_v57  ;;  %v56_v32 = vld [vmem:[%s2559_s1 + $0x90] sm:$0xff] }
  0xd0   :  { %v755_v50 = vadd.f32 %v2153_v47, %v632_v6  ;;  %v756_v49 = vadd.f32 %v2128_v9, %v373_v23  ;;  %419 = vmatmul.f32.gmra.mxu0 %v55_v14 }
  0xd1   :  { %610 = vmatmul.f32.gmra.mxu3 %v2027_v53  ;;  %v956_v63 = vmin.f32 %v840_v41, %v2141_v22  ;;  %v757_v30 = vadd.f32 %v2130_v13, %v504_v54  ;;  %550 = vmatmul.f32.gmra.mxu1 %v55_v14 }
  0xd2   :  { %v871_v18 = vmin.f32 %v755_v50, %v2141_v22  ;;  %681 = vmatmul.f32.gmra.mxu2 %v55_v14  ;;  %v872_v34 = vmin.f32 %v756_v49, %v2141_v22 }
  0xd3   :  { %v1157_v27 = vmul.f32 1.442695, %v956_v63  ;;  %v873_v42 = vmin.f32 %v757_v30, %v2141_v22 }
  0xd4   :  { %v987_v39 = vmul.f32 1.442695, %v871_v18  ;;  %v459_v44 = vpop.f32.mrf.mxu3  ;;  %v1403_v51 = vpop.eup %1402  ;;  %v989_v52 = vmul.f32 1.442695, %v872_v34 }
  0xd5   :  { %v634_v3 = vpop.f32.mrf.mxu2  ;;  %1406 = vpow2.f32 %v1157_v27  ;;  %v460_v58 = vadd.f32 %v459_v44, %v2171_v8  ;;  %v1405_v6 = vpop.eup %1404  ;;  %1211 = vst [vmem:[#allocation6] sm:$0xff] %v1403_v51  ;;  %v991_v0 = vmul.f32 1.442695, %v873_v42 }
  0xd6   :  { %1408 = vpow2.f32 %v987_v39  ;;  %v635_v14 = vadd.f32 %v634_v3, %v2034_v57  ;;  %v375_v23 = vpop.f32.mrf.mxu0  ;;  %1212 = vst [vmem:[#allocation6 + $0x8] sm:$0xff] %v1405_v6  ;;  %v506_v50 = vpop.f32.mrf.mxu1 }
  0xd7   :  { %1410 = vpow2.f32 %v989_v52  ;;  %v376_v41 = vadd.f32 %v375_v23, %v2029_v55  ;;  %v843_v54 = vadd.f32 %v2128_v9, %v460_v58  ;;  %v507_v63 = vadd.f32 %v506_v50, %v2029_v55  ;;  %v2189_v27 = vpop.permute.xlu1 %319 }
  0xd8   :  { %1412 = vpow2.f32 %v991_v0  ;;  %v758_v49 = vadd.f32 %v2153_v47, %v635_v14  ;;  %422 = vmatmul.f32.gmra.mxu0 %v56_v32 }
  0xd9   :  { %v759_v18 = vadd.f32 %v2128_v9, %v376_v41  ;;  %717 = vmatmul.f32.vlgmr.msra.gmra.mxu3 %v1885_v15  ;;  %v959_v57 = vmin.f32 %v843_v54, %v2141_v22  ;;  %v760_v34 = vadd.f32 %v2130_v13, %v507_v63  ;;  %553 = vmatmul.f32.gmra.mxu1 %v56_v32  ;;  %v57_v54 = vld [vmem:[%s2559_s1 + $0x98] sm:$0xff] }
  0xda   :  { %v874_v30 = vmin.f32 %v758_v49, %v2141_v22  ;;  %684 = vmatmul.f32.gmra.mxu2 %v56_v32 }
  0xdb   :  { %v1407_v39 = vpop.eup %1406  ;;  %v875_v42 = vmin.f32 %v759_v18, %v2141_v22  ;;  %v1163_v44 = vmul.f32 1.442695, %v959_v57  ;;  %v876_v3 = vmin.f32 %v760_v34, %v2141_v22 }
  0xdc   :  { %v1409_v51 = vpop.eup %1408  ;;  %v993_v52 = vmul.f32 1.442695, %v874_v30  ;;  %1298 = vst [vmem:[#allocation6 + $0x2b8] sm:$0xff] %v1407_v39  ;;  %v462_v15 = vpop.f32.mrf.mxu3 }
  0xdd   :  { %v1411_v58 = vpop.eup %1410  ;;  %1213 = vst [vmem:[#allocation6 + $0x10] sm:$0xff] %v1409_v51  ;;  %v995_v6 = vmul.f32 1.442695, %v875_v42  ;;  %v637_v0 = vpop.f32.mrf.mxu2  ;;  %1414 = vpow2.f32 %v1163_v44  ;;  %v463_v14 = vadd.f32 %v462_v15, %v2189_v27  ;;  %v997_v32 = vmul.f32 1.442695, %v876_v3 }
  0xde   :  { %v1413_v23 = vpop.eup %1412  ;;  %1214 = vst [vmem:[#allocation6 + $0x18] sm:$0xff] %v1411_v58  ;;  %1416 = vpow2.f32 %v993_v52  ;;  %v638_v41 = vadd.f32 %v637_v0, %v2029_v55  ;;  %v378_v50 = vpop.f32.mrf.mxu0 }
  0xdf   :  { %1215 = vst [vmem:[#allocation6 + $0x20] sm:$0xff] %v1413_v23  ;;  %1418 = vpow2.f32 %v995_v6  ;;  %v379_v49 = vadd.f32 %v378_v50, %v2043_v60  ;;  %v509_v63 = vpop.f32.mrf.mxu1  ;;  %v846_v18 = vadd.f32 %v2128_v9, %v463_v14  ;;  %v2207_v44 = vpop.permute.xlu2 %324 }
  0xe0   :  { %1420 = vpow2.f32 %v997_v32  ;;  %v761_v57 = vadd.f32 %v2153_v47, %v638_v41  ;;  %v510_v30 = vadd.f32 %v509_v63, %v2043_v60  ;;  %425 = vmatmul.f32.gmra.mxu0 %v57_v54  ;;  %v58_v63 = vld [vmem:[%s2559_s1 + $0xa0] sm:$0xff] }
  0xe1   :  { %v762_v34 = vadd.f32 %v2128_v9, %v379_v49  ;;  %720 = vmatmul.f32.gmra.mxu3 %v1907_v21  ;;  %v962_v55 = vmin.f32 %v846_v18, %v2141_v22  ;;  %556 = vmatmul.f32.gmra.mxu1 %v57_v54 }
  0xe2   :  { %v877_v39 = vmin.f32 %v761_v57, %v2141_v22  ;;  %v763_v42 = vadd.f32 %v2130_v13, %v510_v30  ;;  %687 = vmatmul.f32.gmra.mxu2 %v57_v54 }
  0xe3   :  { %v1415_v51 = vpop.eup %1414  ;;  %v878_v52 = vmin.f32 %v762_v34, %v2141_v22  ;;  %v1169_v3 = vmul.f32 1.442695, %v962_v55 }
  0xe4   :  { %v1417_v15 = vpop.eup %1416  ;;  %v999_v58 = vmul.f32 1.442695, %v877_v39  ;;  %v879_v6 = vmin.f32 %v763_v42, %v2141_v22  ;;  %1301 = vst [vmem:[#allocation6 + $0x2d0] sm:$0xff] %v1415_v51  ;;  %v465_v21 = vpop.f32.mrf.mxu3 }
  0xe5   :  { %v1419_v0 = vpop.eup %1418  ;;  %1216 = vst [vmem:[#allocation6 + $0x28] sm:$0xff] %v1417_v15  ;;  %v1001_v14 = vmul.f32 1.442695, %v878_v52  ;;  %v640_v23 = vpop.f32.mrf.mxu2  ;;  %1422 = vpow2.f32 %v1169_v3  ;;  %v466_v32 = vadd.f32 %v465_v21, %v2207_v44 }
  0xe6   :  { %v1421_v41 = vpop.eup %1420  ;;  %1217 = vst [vmem:[#allocation6 + $0x30] sm:$0xff] %v1419_v0  ;;  %1424 = vpow2.f32 %v999_v58  ;;  %v1003_v50 = vmul.f32 1.442695, %v879_v6  ;;  %v641_v54 = vadd.f32 %v640_v23, %v2043_v60  ;;  %v381_v49 = vpop.f32.mrf.mxu0 }
  0xe7   :  { %1218 = vst [vmem:[#allocation6 + $0x38] sm:$0xff] %v1421_v41  ;;  %1426 = vpow2.f32 %v1001_v14  ;;  %v382_v18 = vadd.f32 %v381_v49, %v1985_v40  ;;  %v512_v57 = vpop.f32.mrf.mxu1  ;;  %v849_v30 = vadd.f32 %v2128_v9, %v466_v32  ;;  %v2225_v52 = vpop.permute.xlu0 %329 }
  0xe8   :  { %1428 = vpow2.f32 %v1003_v50  ;;  %v764_v34 = vadd.f32 %v2153_v47, %v641_v54  ;;  %v513_v55 = vadd.f32 %v512_v57, %v1985_v40  ;;  %428 = vmatmul.f32.gmra.mxu0 %v58_v63 }
  0xe9   :  { %v765_v39 = vadd.f32 %v2128_v9, %v382_v18  ;;  %723 = vmatmul.f32.gmra.mxu3 %v1927_v26  ;;  %v965_v60 = vmin.f32 %v849_v30, %v2141_v22  ;;  %559 = vmatmul.f32.gmra.mxu1 %v58_v63  ;;  %v59_v18 = vld [vmem:[%s2559_s1 + $0xa8] sm:$0xff] }
  0xea   :  { %v880_v42 = vmin.f32 %v764_v34, %v2141_v22  ;;  %v766_v51 = vadd.f32 %v2130_v13, %v513_v55  ;;  %690 = vmatmul.f32.gmra.mxu2 %v58_v63 }
  0xeb   :  { %v1423_v3 = vpop.eup %1422  ;;  %v881_v15 = vmin.f32 %v765_v39, %v2141_v22  ;;  %v1175_v58 = vmul.f32 1.442695, %v965_v60 }
  0xec   :  { %v1425_v6 = vpop.eup %1424  ;;  %v1005_v21 = vmul.f32 1.442695, %v880_v42  ;;  %v882_v0 = vmin.f32 %v766_v51, %v2141_v22  ;;  %1304 = vst [vmem:[#allocation6 + $0x2e8] sm:$0xff] %v1423_v3  ;;  %v468_v26 = vpop.f32.mrf.mxu3 }
  0xed   :  { %v1427_v14 = vpop.eup %1426  ;;  %1219 = vst [vmem:[#allocation6 + $0x40] sm:$0xff] %v1425_v6  ;;  %v1007_v23 = vmul.f32 1.442695, %v881_v15  ;;  %v643_v32 = vpop.f32.mrf.mxu2  ;;  %1430 = vpow2.f32 %v1175_v58  ;;  %v469_v41 = vadd.f32 %v468_v26, %v2225_v52 }
  0xee   :  { %v1429_v50 = vpop.eup %1428  ;;  %1220 = vst [vmem:[#allocation6 + $0x48] sm:$0xff] %v1427_v14  ;;  %1432 = vpow2.f32 %v1005_v21  ;;  %v1009_v54 = vmul.f32 1.442695, %v882_v0  ;;  %v644_v49 = vadd.f32 %v643_v32, %v1985_v40  ;;  %v384_v63 = vpop.f32.mrf.mxu0 }
  0xef   :  { %1221 = vst [vmem:[#allocation6 + $0x50] sm:$0xff] %v1429_v50  ;;  %1434 = vpow2.f32 %v1007_v23  ;;  %v385_v57 = vadd.f32 %v384_v63, %v2002_v46  ;;  %v515_v30 = vpop.f32.mrf.mxu1  ;;  %v852_v34 = vadd.f32 %v2128_v9, %v469_v41  ;;  %v2243_v3 = vpop.permute.xlu1 %334 }
  0xf0   :  { %1436 = vpow2.f32 %v1009_v54  ;;  %v767_v55 = vadd.f32 %v2153_v47, %v644_v49  ;;  %v516_v39 = vadd.f32 %v515_v30, %v2002_v46  ;;  %431 = vmatmul.f32.gmra.mxu0 %v59_v18 }
  0xf1   :  { %v768_v60 = vadd.f32 %v2128_v9, %v385_v57  ;;  %726 = vmatmul.f32.gmra.mxu3 %v1947_v33  ;;  %v968_v40 = vmin.f32 %v852_v34, %v2141_v22  ;;  %562 = vmatmul.f32.gmra.mxu1 %v59_v18 }
  0xf2   :  { %v883_v42 = vmin.f32 %v767_v55, %v2141_v22  ;;  %v769_v51 = vadd.f32 %v2130_v13, %v516_v39  ;;  %693 = vmatmul.f32.gmra.mxu2 %v59_v18  ;;  %v60_v18 = vld [vmem:[%s2559_s1 + $0xb0] sm:$0xff] }
  0xf3   :  { %v1431_v15 = vpop.eup %1430  ;;  %v884_v58 = vmin.f32 %v768_v60, %v2141_v22  ;;  %v1181_v6 = vmul.f32 1.442695, %v968_v40 }
  0xf4   :  { %v1433_v21 = vpop.eup %1432  ;;  %v1011_v0 = vmul.f32 1.442695, %v883_v42  ;;  %v885_v26 = vmin.f32 %v769_v51, %v2141_v22  ;;  %1307 = vst [vmem:[#allocation6 + $0x300] sm:$0xff] %v1431_v15  ;;  %v471_v33 = vpop.f32.mrf.mxu3 }
  0xf5   :  { %v1435_v14 = vpop.eup %1434  ;;  %1222 = vst [vmem:[#allocation6 + $0x58] sm:$0xff] %v1433_v21  ;;  %v1013_v23 = vmul.f32 1.442695, %v884_v58  ;;  %v646_v32 = vpop.f32.mrf.mxu2  ;;  %1438 = vpow2.f32 %v1181_v6  ;;  %v472_v41 = vadd.f32 %v471_v33, %v2243_v3 }
  0xf6   :  { %v1437_v50 = vpop.eup %1436  ;;  %1223 = vst [vmem:[#allocation6 + $0x60] sm:$0xff] %v1435_v14  ;;  %1440 = vpow2.f32 %v1011_v0  ;;  %v1015_v54 = vmul.f32 1.442695, %v885_v26  ;;  %v647_v49 = vadd.f32 %v646_v32, %v2002_v46  ;;  %v387_v63 = vpop.f32.mrf.mxu0 }
  0xf7   :  { %1224 = vst [vmem:[#allocation6 + $0x68] sm:$0xff] %v1437_v50  ;;  %1442 = vpow2.f32 %v1013_v23  ;;  %v388_v57 = vadd.f32 %v387_v63, %v2049_v62  ;;  %v518_v30 = vpop.f32.mrf.mxu1  ;;  %v855_v34 = vadd.f32 %v2128_v9, %v472_v41  ;;  %v2261_v51 = vpop.permute.xlu2 %339  ;;  %v61_v63 = vld [vmem:[%s2559_s1 + $0xb8] sm:$0xff] }
  0xf8   :  { %1444 = vpow2.f32 %v1015_v54  ;;  %v770_v55 = vadd.f32 %v2153_v47, %v647_v49  ;;  %v519_v39 = vadd.f32 %v518_v30, %v2049_v62  ;;  %434 = vmatmul.f32.gmra.mxu0 %v60_v18 }
  0xf9   :  { %v771_v60 = vadd.f32 %v2128_v9, %v388_v57  ;;  %729 = vmatmul.f32.gmra.mxu3 %v1964_v37  ;;  %v971_v46 = vmin.f32 %v855_v34, %v2141_v22  ;;  %565 = vmatmul.f32.gmra.mxu1 %v60_v18 }
  0xfa   :  { %v886_v40 = vmin.f32 %v770_v55, %v2141_v22  ;;  %v772_v42 = vadd.f32 %v2130_v13, %v519_v39  ;;  %696 = vmatmul.f32.gmra.mxu2 %v60_v18 }
  0xfb   :  { %v1439_v15 = vpop.eup %1438  ;;  %v887_v58 = vmin.f32 %v771_v60, %v2141_v22  ;;  %v1187_v6 = vmul.f32 1.442695, %v971_v46 }
  0xfc   :  { %v1441_v21 = vpop.eup %1440  ;;  %v1017_v0 = vmul.f32 1.442695, %v886_v40  ;;  %v888_v26 = vmin.f32 %v772_v42, %v2141_v22  ;;  %1310 = vst [vmem:[#allocation6 + $0x318] sm:$0xff] %v1439_v15  ;;  %v474_v37 = vpop.f32.mrf.mxu3 }
  0xfd   :  { %v1443_v33 = vpop.eup %1442  ;;  %1225 = vst [vmem:[#allocation6 + $0x70] sm:$0xff] %v1441_v21  ;;  %v1019_v14 = vmul.f32 1.442695, %v887_v58  ;;  %v649_v23 = vpop.f32.mrf.mxu2  ;;  %1446 = vpow2.f32 %v1187_v6  ;;  %v475_v32 = vadd.f32 %v474_v37, %v2261_v51 }
  0xfe   :  { %v1445_v41 = vpop.eup %1444  ;;  %1226 = vst [vmem:[#allocation6 + $0x78] sm:$0xff] %v1443_v33  ;;  %1448 = vpow2.f32 %v1017_v0  ;;  %v1021_v50 = vmul.f32 1.442695, %v888_v26  ;;  %v650_v54 = vadd.f32 %v649_v23, %v2049_v62  ;;  %v390_v49 = vpop.f32.mrf.mxu0 }
  0xff   :  { %1227 = vst [vmem:[#allocation6 + $0x80] sm:$0xff] %v1445_v41  ;;  %1450 = vpow2.f32 %v1019_v14  ;;  %v391_v18 = vadd.f32 %v390_v49, %v2058_v1  ;;  %v521_v57 = vpop.f32.mrf.mxu1  ;;  %v858_v30 = vadd.f32 %v2128_v9, %v475_v32  ;;  %v2279_v40 = vpop.permute.xlu0 %344 }
 0x100   :  { %1452 = vpow2.f32 %v1021_v50  ;;  %v773_v34 = vadd.f32 %v2153_v47, %v650_v54  ;;  %v522_v55 = vadd.f32 %v521_v57, %v2058_v1  ;;  %437 = vmatmul.f32.gmra.mxu0 %v61_v63  ;;  %v62_v54 = vld [vmem:[%s2559_s1 + $0xc0] sm:$0xff] }
 0x101   :  { %v774_v39 = vadd.f32 %v2128_v9, %v391_v18  ;;  %732 = vmatmul.f32.gmra.mxu3 %v1978_v35  ;;  %v974_v62 = vmin.f32 %v858_v30, %v2141_v22  ;;  %568 = vmatmul.f32.gmra.mxu1 %v61_v63 }
 0x102   :  { %v889_v60 = vmin.f32 %v773_v34, %v2141_v22  ;;  %v775_v46 = vadd.f32 %v2130_v13, %v522_v55  ;;  %699 = vmatmul.f32.gmra.mxu2 %v61_v63 }
 0x103   :  { %v1447_v42 = vpop.eup %1446  ;;  %v890_v15 = vmin.f32 %v774_v39, %v2141_v22  ;;  %v1193_v58 = vmul.f32 1.442695, %v974_v62  ;;  %v2297_v62 = vpop.permute.xlu1 %349 }
 0x104   :  { %v1449_v6 = vpop.eup %1448  ;;  %v1023_v21 = vmul.f32 1.442695, %v889_v60  ;;  %v891_v0 = vmin.f32 %v775_v46, %v2141_v22  ;;  %1313 = vst [vmem:[#allocation6 + $0x330] sm:$0xff] %v1447_v42  ;;  %v477_v35 = vpop.f32.mrf.mxu3 }
 0x105   :  { %v1451_v26 = vpop.eup %1450  ;;  %1228 = vst [vmem:[#allocation6 + $0x88] sm:$0xff] %v1449_v6  ;;  %v1025_v37 = vmul.f32 1.442695, %v890_v15  ;;  %v652_v33 = vpop.f32.mrf.mxu2  ;;  %1454 = vpow2.f32 %v1193_v58  ;;  %v478_v14 = vadd.f32 %v477_v35, %v2279_v40 }
 0x106   :  { %v1453_v23 = vpop.eup %1452  ;;  %1229 = vst [vmem:[#allocation6 + $0x90] sm:$0xff] %v1451_v26  ;;  %1456 = vpow2.f32 %v1023_v21  ;;  %v1027_v32 = vmul.f32 1.442695, %v891_v0  ;;  %v653_v41 = vadd.f32 %v652_v33, %v2058_v1  ;;  %v393_v50 = vpop.f32.mrf.mxu0 }
 0x107   :  { %1230 = vst [vmem:[#allocation6 + $0x98] sm:$0xff] %v1453_v23  ;;  %1458 = vpow2.f32 %v1025_v37  ;;  %v394_v49 = vadd.f32 %v393_v50, %v2031_v56  ;;  %v524_v63 = vpop.f32.mrf.mxu1  ;;  %v861_v18 = vadd.f32 %v2128_v9, %v478_v14 }
 0x108   :  { %1460 = vpow2.f32 %v1027_v32  ;;  %v776_v57 = vadd.f32 %v2153_v47, %v653_v41  ;;  %v525_v30 = vadd.f32 %v524_v63, %v2031_v56  ;;  %440 = vmatmul.f32.gmra.mxu0 %v62_v54  ;;  %v63_v32 = vld [vmem:[%s2559_s1 + $0xc8] sm:$0xff] }
 0x109   :  { %v777_v34 = vadd.f32 %v2128_v9, %v394_v49  ;;  %735 = vmatmul.f32.gmra.mxu3 %v1994_v43  ;;  %v977_v1 = vmin.f32 %v861_v18, %v2141_v22  ;;  %571 = vmatmul.f32.gmra.mxu1 %v62_v54 }
 0x10a   :  { %v892_v55 = vmin.f32 %v776_v57, %v2141_v22  ;;  %v778_v39 = vadd.f32 %v2130_v13, %v525_v30  ;;  %702 = vmatmul.f32.gmra.mxu2 %v62_v54 }
 0x10b   :  { %v1455_v60 = vpop.eup %1454  ;;  %v893_v46 = vmin.f32 %v777_v34, %v2141_v22  ;;  %v1199_v42 = vmul.f32 1.442695, %v977_v1 }
 0x10c   :  { %v1457_v15 = vpop.eup %1456  ;;  %v1029_v58 = vmul.f32 1.442695, %v892_v55  ;;  %v894_v6 = vmin.f32 %v778_v39, %v2141_v22  ;;  %1316 = vst [vmem:[#allocation6 + $0x348] sm:$0xff] %v1455_v60  ;;  %v480_v43 = vpop.f32.mrf.mxu3 }
 0x10d   :  { %v1459_v21 = vpop.eup %1458  ;;  %1231 = vst [vmem:[#allocation6 + $0xa0] sm:$0xff] %v1457_v15  ;;  %v1031_v0 = vmul.f32 1.442695, %v893_v46  ;;  %v655_v35 = vpop.f32.mrf.mxu2  ;;  %1462 = vpow2.f32 %v1199_v42  ;;  %v481_v26 = vadd.f32 %v480_v43, %v2297_v62 }
 0x10e   :  { %v1461_v37 = vpop.eup %1460  ;;  %1232 = vst [vmem:[#allocation6 + $0xa8] sm:$0xff] %v1459_v21  ;;  %1464 = vpow2.f32 %v1029_v58  ;;  %v1033_v33 = vmul.f32 1.442695, %v894_v6  ;;  %v656_v14 = vadd.f32 %v655_v35, %v2031_v56  ;;  %v396_v23 = vpop.f32.mrf.mxu0 }
 0x10f   :  { %1233 = vst [vmem:[#allocation6 + $0xb0] sm:$0xff] %v1461_v37  ;;  %1466 = vpow2.f32 %v1031_v0  ;;  %v397_v41 = vadd.f32 %v396_v23, %v2064_v4  ;;  %v527_v50 = vpop.f32.mrf.mxu1  ;;  %v864_v54 = vadd.f32 %v2128_v9, %v481_v26  ;;  %v64_v26 = vld [vmem:[%s2559_s1 + $0xd0] sm:$0xff] }
 0x110   :  { %1468 = vpow2.f32 %v1033_v33  ;;  %v779_v49 = vadd.f32 %v2153_v47, %v656_v14  ;;  %v528_v63 = vadd.f32 %v527_v50, %v2064_v4  ;;  %443 = vmatmul.f32.gmra.mxu0 %v63_v32 }
 0x111   :  { %v780_v18 = vadd.f32 %v2128_v9, %v397_v41  ;;  %738 = vmatmul.f32.gmra.mxu3 %v2010_v48  ;;  %v980_v56 = vmin.f32 %v864_v54, %v2141_v22  ;;  %574 = vmatmul.f32.gmra.mxu1 %v63_v32 }
 0x112   :  { %v895_v57 = vmin.f32 %v779_v49, %v2141_v22  ;;  %v781_v30 = vadd.f32 %v2130_v13, %v528_v63  ;;  %705 = vmatmul.f32.gmra.mxu2 %v63_v32 }
 0x113   :  { %v1463_v34 = vpop.eup %1462  ;;  %v896_v1 = vmin.f32 %v780_v18, %v2141_v22  ;;  %v1205_v55 = vmul.f32 1.442695, %v980_v56 }
 0x114   :  { %v1465_v39 = vpop.eup %1464  ;;  %v1035_v60 = vmul.f32 1.442695, %v895_v57  ;;  %v897_v46 = vmin.f32 %v781_v30, %v2141_v22  ;;  %1319 = vst [vmem:[#allocation6 + $0x360] sm:$0xff] %v1463_v34  ;;  %v587_v42 = vpop.f32.mrf.mxu3 }
 0x115   :  { %v1467_v15 = vpop.eup %1466  ;;  %1234 = vst [vmem:[#allocation6 + $0xb8] sm:$0xff] %v1465_v39  ;;  %v1037_v48 = vmul.f32 1.442695, %v896_v1  ;;  %v588_v58 = vadd.f32 %v587_v42, %v2147_v31  ;;  %v658_v6 = vpop.f32.mrf.mxu2  ;;  %1470 = vpow2.f32 %v1205_v55 }
 0x116   :  { %v1469_v43 = vpop.eup %1468  ;;  %1235 = vst [vmem:[#allocation6 + $0xc0] sm:$0xff] %v1467_v15  ;;  %1472 = vpow2.f32 %v1035_v60  ;;  %v1039_v21 = vmul.f32 1.442695, %v897_v46  ;;  %v659_v0 = vadd.f32 %v658_v6, %v2064_v4  ;;  %v399_v35 = vpop.f32.mrf.mxu0 }
 0x117   :  { %1236 = vst [vmem:[#allocation6 + $0xc8] sm:$0xff] %v1469_v43  ;;  %1474 = vpow2.f32 %v1037_v48  ;;  %v841_v37 = vadd.f32 %v2130_v13, %v588_v58  ;;  %v400_v33 = vadd.f32 %v399_v35, %v2070_v7  ;;  %v530_v14 = vpop.f32.mrf.mxu1  ;;  %v65_v48 = vld [vmem:[%s2559_s1 + $0xd8] sm:$0xff] }
 0x118   :  { %1476 = vpow2.f32 %v1039_v21  ;;  %v782_v23 = vadd.f32 %v2153_v47, %v659_v0  ;;  %v531_v32 = vadd.f32 %v530_v14, %v2070_v7  ;;  %446 = vmatmul.f32.gmra.mxu0 %v64_v26 }
 0x119   :  { %v957_v41 = vmin.f32 %v841_v37, %v2141_v22  ;;  %v783_v4 = vadd.f32 %v2128_v9, %v400_v33  ;;  %741 = vmatmul.f32.gmra.mxu3 %v2027_v53  ;;  %577 = vmatmul.f32.gmra.mxu1 %v64_v26 }
 0x11a   :  { %v898_v50 = vmin.f32 %v782_v23, %v2141_v22  ;;  %v784_v54 = vadd.f32 %v2130_v13, %v531_v32  ;;  %708 = vmatmul.f32.gmra.mxu2 %v64_v26 }
 0x11b   :  { %v1471_v49 = vpop.eup %1470  ;;  %v1159_v63 = vmul.f32 1.442695, %v957_v41  ;;  %v899_v18 = vmin.f32 %v783_v4, %v2141_v22 }
 0x11c   :  { %v1473_v56 = vpop.eup %1472  ;;  %v1041_v57 = vmul.f32 1.442695, %v898_v50  ;;  %v900_v30 = vmin.f32 %v784_v54, %v2141_v22  ;;  %1322 = vst [vmem:[#allocation6 + $0x378] sm:$0xff] %v1471_v49  ;;  %v590_v34 = vpop.f32.mrf.mxu3 }
 0x11d   :  { %v1475_v1 = vpop.eup %1474  ;;  %1237 = vst [vmem:[#allocation6 + $0xd0] sm:$0xff] %v1473_v56  ;;  %1478 = vpow2.f32 %v1159_v63  ;;  %v1043_v53 = vmul.f32 1.442695, %v899_v18  ;;  %v591_v55 = vadd.f32 %v590_v34, %v2171_v8  ;;  %v661_v39 = vpop.f32.mrf.mxu2 }
 0x11e   :  { %v1477_v60 = vpop.eup %1476  ;;  %1238 = vst [vmem:[#allocation6 + $0xd8] sm:$0xff] %v1475_v1  ;;  %1480 = vpow2.f32 %v1041_v57  ;;  %v1045_v46 = vmul.f32 1.442695, %v900_v30  ;;  %v662_v42 = vadd.f32 %v661_v39, %v2070_v7  ;;  %v402_v15 = vpop.f32.mrf.mxu0  ;;  %v66_v1 = vld [vmem:[%s2559_s1 + $0xe0] sm:$0xff]  ;;  %s1686_s1 = smov [#allocation6]  }
 0x11f   :  { %1239 = vst [vmem:[#allocation6 + $0xe0] sm:$0xff] %v1477_v60  ;;  %1482 = vpow2.f32 %v1043_v53  ;;  %v844_v58 = vadd.f32 %v2130_v13, %v591_v55  ;;  %v403_v6 = vadd.f32 %v402_v15, %v2045_v61  ;;  %v533_v43 = vpop.f32.mrf.mxu1  ;;  %s1329_s21 = sshll.u32 %s1686_s1, 4  ;;  %s1330_s21 = int_to_ptr.vmem [resolvable:$true] %s1329_s21 }
 0x120   :  { %1484 = vpow2.f32 %v1045_v46  ;;  %v785_v21 = vadd.f32 %v2153_v47, %v662_v42  ;;  %v534_v0 = vadd.f32 %v533_v43, %v2045_v61  ;;  %449 = vmatmul.f32.gmra.mxu0 %v65_v48 }
 0x121   :  { %v960_v35 = vmin.f32 %v844_v58, %v2141_v22  ;;  %v786_v7 = vadd.f32 %v2128_v9, %v403_v6  ;;  %580 = vmatmul.f32.gmra.mxu1 %v65_v48 }
 0x122   :  { %v901_v26 = vmin.f32 %v785_v21, %v2141_v22  ;;  %v787_v37 = vadd.f32 %v2130_v13, %v534_v0  ;;  %711 = vmatmul.f32.gmra.mxu2 %v65_v48 }
 0x123   :  { %v1479_v33 = vpop.eup %1478  ;;  %v1165_v14 = vmul.f32 1.442695, %v960_v35  ;;  %v902_v23 = vmin.f32 %v786_v7, %v2141_v22 }
 0x124   :  { %v1481_v32 = vpop.eup %1480  ;;  %1299 = vst [vmem:[#allocation6 + $0x2c0] sm:$0xff] %v1479_v33  ;;  %v1047_v41 = vmul.f32 1.442695, %v901_v26  ;;  %v903_v4 = vmin.f32 %v787_v37, %v2141_v22  ;;  %v593_v50 = vpop.f32.mrf.mxu3 }
 0x125   :  { %v1483_v54 = vpop.eup %1482  ;;  %1240 = vst [vmem:[#allocation6 + $0xe8] sm:$0xff] %v1481_v32  ;;  %1486 = vpow2.f32 %v1165_v14  ;;  %v1049_v49 = vmul.f32 1.442695, %v902_v23  ;;  %v594_v63 = vadd.f32 %v593_v50, %v2189_v27  ;;  %v664_v18 = vpop.f32.mrf.mxu2 }
 0x126   :  { %v1485_v56 = vpop.eup %1484  ;;  %1241 = vst [vmem:[#allocation6 + $0xf0] sm:$0xff] %v1483_v54  ;;  %1488 = vpow2.f32 %v1047_v41  ;;  %v1051_v57 = vmul.f32 1.442695, %v903_v4  ;;  %v665_v30 = vadd.f32 %v664_v18, %v2045_v61  ;;  %v405_v34 = vpop.f32.mrf.mxu0 }
 0x127   :  { %1242 = vst [vmem:[#allocation6 + $0xf8] sm:$0xff] %v1485_v56  ;;  %1490 = vpow2.f32 %v1049_v49  ;;  %v847_v53 = vadd.f32 %v2130_v13, %v594_v63  ;;  %v406_v55 = vadd.f32 %v405_v34, %v2074_v19  ;;  %v536_v39 = vpop.f32.mrf.mxu1 }
 0x128   :  { %1492 = vpow2.f32 %v1051_v57  ;;  %v788_v60 = vadd.f32 %v2153_v47, %v665_v30  ;;  %v537_v46 = vadd.f32 %v536_v39, %v2074_v19  ;;  %452 = vmatmul.f32.gmra.mxu0 %v66_v1 }
 0x129   :  { %v963_v42 = vmin.f32 %v847_v53, %v2141_v22  ;;  %v789_v61 = vadd.f32 %v2128_v9, %v406_v55  ;;  %583 = vmatmul.f32.gmra.mxu1 %v66_v1 }
 0x12a   :  { %v904_v15 = vmin.f32 %v788_v60, %v2141_v22  ;;  %v790_v48 = vadd.f32 %v2130_v13, %v537_v46  ;;  %714 = vmatmul.f32.gmra.mxu2 %v66_v1 }
 0x12b   :  { %v1487_v58 = vpop.eup %1486  ;;  %v1171_v6 = vmul.f32 1.442695, %v963_v42  ;;  %v905_v43 = vmin.f32 %v789_v61, %v2141_v22 }
 0x12c   :  { %v1489_v21 = vpop.eup %1488  ;;  %1302 = vst [vmem:[#allocation6 + $0x2d8] sm:$0xff] %v1487_v58  ;;  %v1053_v0 = vmul.f32 1.442695, %v904_v15  ;;  %v906_v35 = vmin.f32 %v790_v48, %v2141_v22  ;;  %v596_v7 = vpop.f32.mrf.mxu3 }
 0x12d   :  { %v1491_v26 = vpop.eup %1490  ;;  %1243 = vst [vmem:[#allocation6 + $0x100] sm:$0xff] %v1489_v21  ;;  %1494 = vpow2.f32 %v1171_v6  ;;  %v1055_v37 = vmul.f32 1.442695, %v905_v43  ;;  %v597_v33 = vadd.f32 %v596_v7, %v2207_v44  ;;  %v667_v14 = vpop.f32.mrf.mxu2 }
 0x12e   :  { %v1493_v23 = vpop.eup %1492  ;;  %1244 = vst [vmem:[#allocation6 + $0x108] sm:$0xff] %v1491_v26  ;;  %1496 = vpow2.f32 %v1053_v0  ;;  %v1057_v32 = vmul.f32 1.442695, %v906_v35  ;;  %v668_v41 = vadd.f32 %v667_v14, %v2074_v19  ;;  %v408_v4 = vpop.f32.mrf.mxu0 }
 0x12f   :  { %1245 = vst [vmem:[#allocation6 + $0x110] sm:$0xff] %v1493_v23  ;;  %1498 = vpow2.f32 %v1055_v37  ;;  %v850_v50 = vadd.f32 %v2130_v13, %v597_v33  ;;  %v409_v54 = vadd.f32 %v408_v4, %v2082_v12  ;;  %v539_v49 = vpop.f32.mrf.mxu1 }
 0x130   :  { %1500 = vpow2.f32 %v1057_v32  ;;  %v791_v63 = vadd.f32 %v2153_v47, %v668_v41  ;;  %v540_v18 = vadd.f32 %v539_v49, %v2082_v12 }
 0x131   :  { %v966_v56 = vmin.f32 %v850_v50, %v2141_v22  ;;  %v792_v57 = vadd.f32 %v2128_v9, %v409_v54 }
 0x132   :  { %v907_v30 = vmin.f32 %v791_v63, %v2141_v22  ;;  %v793_v19 = vadd.f32 %v2130_v13, %v540_v18 }
 0x133   :  { %v1495_v34 = vpop.eup %1494  ;;  %v1177_v1 = vmul.f32 1.442695, %v966_v56  ;;  %v908_v53 = vmin.f32 %v792_v57, %v2141_v22 }
 0x134   :  { %v1497_v55 = vpop.eup %1496  ;;  %1305 = vst [vmem:[#allocation6 + $0x2f0] sm:$0xff] %v1495_v34  ;;  %v1059_v39 = vmul.f32 1.442695, %v907_v30  ;;  %v909_v60 = vmin.f32 %v793_v19, %v2141_v22  ;;  %v599_v46 = vpop.f32.mrf.mxu3 }
 0x135   :  { %v1499_v42 = vpop.eup %1498  ;;  %1246 = vst [vmem:[#allocation6 + $0x118] sm:$0xff] %v1497_v55  ;;  %1502 = vpow2.f32 %v1177_v1  ;;  %v1061_v61 = vmul.f32 1.442695, %v908_v53  ;;  %v600_v15 = vadd.f32 %v599_v46, %v2225_v52  ;;  %v670_v48 = vpop.f32.mrf.mxu2 }
 0x136   :  { %v1501_v58 = vpop.eup %1500  ;;  %1247 = vst [vmem:[#allocation6 + $0x120] sm:$0xff] %v1499_v42  ;;  %1504 = vpow2.f32 %v1059_v39  ;;  %v1063_v6 = vmul.f32 1.442695, %v909_v60  ;;  %v671_v43 = vadd.f32 %v670_v48, %v2082_v12  ;;  %v411_v21 = vpop.f32.mrf.mxu0 }
 0x137   :  { %1248 = vst [vmem:[#allocation6 + $0x128] sm:$0xff] %v1501_v58  ;;  %1506 = vpow2.f32 %v1061_v61  ;;  %v853_v0 = vadd.f32 %v2130_v13, %v600_v15  ;;  %v412_v35 = vadd.f32 %v411_v21, %v2061_v10  ;;  %v542_v7 = vpop.f32.mrf.mxu1 }
 0x138   :  { %1508 = vpow2.f32 %v1063_v6  ;;  %v794_v26 = vadd.f32 %v2153_v47, %v671_v43  ;;  %v543_v37 = vadd.f32 %v542_v7, %v2061_v10 }
 0x139   :  { %v969_v33 = vmin.f32 %v853_v0, %v2141_v22  ;;  %v795_v14 = vadd.f32 %v2128_v9, %v412_v35 }
 0x13a   :  { %v910_v23 = vmin.f32 %v794_v26, %v2141_v22  ;;  %v796_v12 = vadd.f32 %v2130_v13, %v543_v37 }
 0x13b   :  { %v1503_v32 = vpop.eup %1502  ;;  %v1183_v41 = vmul.f32 1.442695, %v969_v33  ;;  %v911_v4 = vmin.f32 %v795_v14, %v2141_v22 }
 0x13c   :  { %v1505_v50 = vpop.eup %1504  ;;  %1308 = vst [vmem:[#allocation6 + $0x308] sm:$0xff] %v1503_v32  ;;  %v1065_v54 = vmul.f32 1.442695, %v910_v23  ;;  %v912_v49 = vmin.f32 %v796_v12, %v2141_v22  ;;  %v602_v63 = vpop.f32.mrf.mxu3 }
 0x13d   :  { %v1507_v18 = vpop.eup %1506  ;;  %1249 = vst [vmem:[#allocation6 + $0x130] sm:$0xff] %v1505_v50  ;;  %1510 = vpow2.f32 %v1183_v41  ;;  %v1067_v56 = vmul.f32 1.442695, %v911_v4  ;;  %v603_v57 = vadd.f32 %v602_v63, %v2243_v3  ;;  %v673_v30 = vpop.f32.mrf.mxu2 }
 0x13e   :  { %v1509_v19 = vpop.eup %1508  ;;  %1250 = vst [vmem:[#allocation6 + $0x138] sm:$0xff] %v1507_v18  ;;  %1512 = vpow2.f32 %v1065_v54  ;;  %v1069_v34 = vmul.f32 1.442695, %v912_v49  ;;  %v674_v1 = vadd.f32 %v673_v30, %v2061_v10  ;;  %v414_v53 = vpop.f32.mrf.mxu0 }
 0x13f   :  { %1251 = vst [vmem:[#allocation6 + $0x140] sm:$0xff] %v1509_v19  ;;  %1514 = vpow2.f32 %v1067_v56  ;;  %v856_v55 = vadd.f32 %v2130_v13, %v603_v57  ;;  %v415_v39 = vadd.f32 %v414_v53, %v2086_v28  ;;  %v545_v60 = vpop.f32.mrf.mxu1 }
 0x140   :  { %1516 = vpow2.f32 %v1069_v34  ;;  %v797_v46 = vadd.f32 %v2153_v47, %v674_v1  ;;  %v546_v42 = vadd.f32 %v545_v60, %v2086_v28 }
 0x141   :  { %v972_v61 = vmin.f32 %v856_v55, %v2141_v22  ;;  %v798_v15 = vadd.f32 %v2128_v9, %v415_v39 }
 0x142   :  { %v913_v48 = vmin.f32 %v797_v46, %v2141_v22  ;;  %v799_v10 = vadd.f32 %v2130_v13, %v546_v42 }
 0x143   :  { %v1511_v58 = vpop.eup %1510  ;;  %v1189_v6 = vmul.f32 1.442695, %v972_v61  ;;  %v914_v43 = vmin.f32 %v798_v15, %v2141_v22 }
 0x144   :  { %v1513_v21 = vpop.eup %1512  ;;  %1311 = vst [vmem:[#allocation6 + $0x320] sm:$0xff] %v1511_v58  ;;  %v1071_v0 = vmul.f32 1.442695, %v913_v48  ;;  %v915_v35 = vmin.f32 %v799_v10, %v2141_v22  ;;  %v605_v7 = vpop.f32.mrf.mxu3 }
 0x145   :  { %v1515_v26 = vpop.eup %1514  ;;  %1252 = vst [vmem:[#allocation6 + $0x148] sm:$0xff] %v1513_v21  ;;  %1518 = vpow2.f32 %v1189_v6  ;;  %v1073_v37 = vmul.f32 1.442695, %v914_v43  ;;  %v606_v33 = vadd.f32 %v605_v7, %v2261_v51  ;;  %v676_v14 = vpop.f32.mrf.mxu2 }
 0x146   :  { %v1517_v23 = vpop.eup %1516  ;;  %1253 = vst [vmem:[#allocation6 + $0x150] sm:$0xff] %v1515_v26  ;;  %1520 = vpow2.f32 %v1071_v0  ;;  %v1075_v12 = vmul.f32 1.442695, %v915_v35  ;;  %v677_v32 = vadd.f32 %v676_v14, %v2086_v28  ;;  %v417_v41 = vpop.f32.mrf.mxu0 }
 0x147   :  { %1254 = vst [vmem:[#allocation6 + $0x158] sm:$0xff] %v1517_v23  ;;  %1522 = vpow2.f32 %v1073_v37  ;;  %v859_v4 = vadd.f32 %v2130_v13, %v606_v33  ;;  %v418_v50 = vadd.f32 %v417_v41, %v2094_v17  ;;  %v548_v54 = vpop.f32.mrf.mxu1 }
 0x148   :  { %1524 = vpow2.f32 %v1075_v12  ;;  %v800_v49 = vadd.f32 %v2153_v47, %v677_v32  ;;  %v549_v63 = vadd.f32 %v548_v54, %v2094_v17 }
 0x149   :  { %v975_v18 = vmin.f32 %v859_v4, %v2141_v22  ;;  %v801_v56 = vadd.f32 %v2128_v9, %v418_v50 }
 0x14a   :  { %v916_v57 = vmin.f32 %v800_v49, %v2141_v22  ;;  %v802_v28 = vadd.f32 %v2130_v13, %v549_v63 }
 0x14b   :  { %v1519_v30 = vpop.eup %1518  ;;  %v1195_v19 = vmul.f32 1.442695, %v975_v18  ;;  %v917_v34 = vmin.f32 %v801_v56, %v2141_v22 }
 0x14c   :  { %v1521_v1 = vpop.eup %1520  ;;  %1314 = vst [vmem:[#allocation6 + $0x338] sm:$0xff] %v1519_v30  ;;  %v1077_v53 = vmul.f32 1.442695, %v916_v57  ;;  %v918_v55 = vmin.f32 %v802_v28, %v2141_v22  ;;  %v608_v39 = vpop.f32.mrf.mxu3 }
 0x14d   :  { %v1523_v60 = vpop.eup %1522  ;;  %1255 = vst [vmem:[#allocation6 + $0x160] sm:$0xff] %v1521_v1  ;;  %1526 = vpow2.f32 %v1195_v19  ;;  %v1079_v46 = vmul.f32 1.442695, %v917_v34  ;;  %v609_v42 = vadd.f32 %v608_v39, %v2279_v40  ;;  %v679_v61 = vpop.f32.mrf.mxu2 }
 0x14e   :  { %v1525_v15 = vpop.eup %1524  ;;  %1256 = vst [vmem:[#allocation6 + $0x168] sm:$0xff] %v1523_v60  ;;  %1528 = vpow2.f32 %v1077_v53  ;;  %v1081_v48 = vmul.f32 1.442695, %v918_v55  ;;  %v680_v10 = vadd.f32 %v679_v61, %v2094_v17  ;;  %v420_v58 = vpop.f32.mrf.mxu0 }
 0x14f   :  { %1257 = vst [vmem:[#allocation6 + $0x170] sm:$0xff] %v1525_v15  ;;  %1530 = vpow2.f32 %v1079_v46  ;;  %v862_v6 = vadd.f32 %v2130_v13, %v609_v42  ;;  %v421_v43 = vadd.f32 %v420_v58, %v2076_v11  ;;  %v551_v21 = vpop.f32.mrf.mxu1 }
 0x150   :  { %1532 = vpow2.f32 %v1081_v48  ;;  %v803_v0 = vadd.f32 %v2153_v47, %v680_v10  ;;  %v552_v35 = vadd.f32 %v551_v21, %v2076_v11 }
 0x151   :  { %v978_v7 = vmin.f32 %v862_v6, %v2141_v22  ;;  %v804_v26 = vadd.f32 %v2128_v9, %v421_v43 }
 0x152   :  { %v919_v37 = vmin.f32 %v803_v0, %v2141_v22  ;;  %v805_v17 = vadd.f32 %v2130_v13, %v552_v35 }
 0x153   :  { %v1527_v33 = vpop.eup %1526  ;;  %v1201_v14 = vmul.f32 1.442695, %v978_v7  ;;  %v920_v23 = vmin.f32 %v804_v26, %v2141_v22 }
 0x154   :  { %v1529_v12 = vpop.eup %1528  ;;  %1317 = vst [vmem:[#allocation6 + $0x350] sm:$0xff] %v1527_v33  ;;  %v1083_v32 = vmul.f32 1.442695, %v919_v37  ;;  %v921_v41 = vmin.f32 %v805_v17, %v2141_v22  ;;  %v611_v4 = vpop.f32.mrf.mxu3 }
 0x155   :  { %v1531_v50 = vpop.eup %1530  ;;  %1258 = vst [vmem:[#allocation6 + $0x178] sm:$0xff] %v1529_v12  ;;  %1534 = vpow2.f32 %v1201_v14  ;;  %v1085_v54 = vmul.f32 1.442695, %v920_v23  ;;  %v612_v49 = vadd.f32 %v611_v4, %v2297_v62  ;;  %v682_v63 = vpop.f32.mrf.mxu2 }
 0x156   :  { %v1533_v18 = vpop.eup %1532  ;;  %1259 = vst [vmem:[#allocation6 + $0x180] sm:$0xff] %v1531_v50  ;;  %1536 = vpow2.f32 %v1083_v32  ;;  %v1087_v56 = vmul.f32 1.442695, %v921_v41  ;;  %v683_v57 = vadd.f32 %v682_v63, %v2076_v11  ;;  %v423_v28 = vpop.f32.mrf.mxu0 }
 0x157   :  { %1260 = vst [vmem:[#allocation6 + $0x188] sm:$0xff] %v1533_v18  ;;  %1538 = vpow2.f32 %v1085_v54  ;;  %v865_v30 = vadd.f32 %v2130_v13, %v612_v49  ;;  %v424_v19 = vadd.f32 %v423_v28, %v2098_v36  ;;  %v554_v34 = vpop.f32.mrf.mxu1 }
 0x158   :  { %1540 = vpow2.f32 %v1087_v56  ;;  %v806_v1 = vadd.f32 %v2153_v47, %v683_v57  ;;  %v555_v53 = vadd.f32 %v554_v34, %v2098_v36 }
 0x159   :  { %v981_v55 = vmin.f32 %v865_v30, %v2141_v22  ;;  %v807_v39 = vadd.f32 %v2128_v9, %v424_v19 }
 0x15a   :  { %v922_v60 = vmin.f32 %v806_v1, %v2141_v22  ;;  %v808_v11 = vadd.f32 %v2130_v13, %v555_v53 }
 0x15b   :  { %v1535_v46 = vpop.eup %1534  ;;  %v1207_v42 = vmul.f32 1.442695, %v981_v55  ;;  %v923_v61 = vmin.f32 %v807_v39, %v2141_v22 }
 0x15c   :  { %v1537_v15 = vpop.eup %1536  ;;  %1320 = vst [vmem:[#allocation6 + $0x368] sm:$0xff] %v1535_v46  ;;  %v1089_v48 = vmul.f32 1.442695, %v922_v60  ;;  %v924_v10 = vmin.f32 %v808_v11, %v2141_v22  ;;  %v718_v58 = vpop.f32.mrf.mxu3 }
 0x15d   :  { %v1539_v6 = vpop.eup %1538  ;;  %1261 = vst [vmem:[#allocation6 + $0x190] sm:$0xff] %v1537_v15  ;;  %1542 = vpow2.f32 %v1207_v42  ;;  %v1091_v43 = vmul.f32 1.442695, %v923_v61  ;;  %v685_v21 = vpop.f32.mrf.mxu2  ;;  %v719_v0 = vadd.f32 %v718_v58, %v2147_v31 }
 0x15e   :  { %v1541_v35 = vpop.eup %1540  ;;  %1262 = vst [vmem:[#allocation6 + $0x198] sm:$0xff] %v1539_v6  ;;  %1544 = vpow2.f32 %v1089_v48  ;;  %v1093_v7 = vmul.f32 1.442695, %v924_v10  ;;  %v686_v26 = vadd.f32 %v685_v21, %v2098_v36  ;;  %v426_v37 = vpop.f32.mrf.mxu0 }
 0x15f   :  { %1263 = vst [vmem:[#allocation6 + $0x1a0] sm:$0xff] %v1541_v35  ;;  %1546 = vpow2.f32 %v1091_v43  ;;  %v842_v17 = vadd.f32 %v2153_v47, %v719_v0  ;;  %v427_v33 = vadd.f32 %v426_v37, %v2106_v20  ;;  %v557_v14 = vpop.f32.mrf.mxu1 }
 0x160   :  { %1548 = vpow2.f32 %v1093_v7  ;;  %v809_v23 = vadd.f32 %v2153_v47, %v686_v26  ;;  %v558_v12 = vadd.f32 %v557_v14, %v2106_v20 }
 0x161   :  { %v958_v31 = vmin.f32 %v842_v17, %v2141_v22  ;;  %v810_v32 = vadd.f32 %v2128_v9, %v427_v33 }
 0x162   :  { %v925_v41 = vmin.f32 %v809_v23, %v2141_v22  ;;  %v811_v36 = vadd.f32 %v2130_v13, %v558_v12 }
 0x163   :  { %v1543_v4 = vpop.eup %1542  ;;  %v1161_v50 = vmul.f32 1.442695, %v958_v31  ;;  %v926_v54 = vmin.f32 %v810_v32, %v2141_v22 }
 0x164   :  { %v1545_v49 = vpop.eup %1544  ;;  %1323 = vst [vmem:[#allocation6 + $0x380] sm:$0xff] %v1543_v4  ;;  %v1095_v63 = vmul.f32 1.442695, %v925_v41  ;;  %v927_v18 = vmin.f32 %v811_v36, %v2141_v22  ;;  %v721_v56 = vpop.f32.mrf.mxu3 }
 0x165   :  { %v1547_v57 = vpop.eup %1546  ;;  %1264 = vst [vmem:[#allocation6 + $0x1a8] sm:$0xff] %v1545_v49  ;;  %1550 = vpow2.f32 %v1161_v50  ;;  %v1097_v28 = vmul.f32 1.442695, %v926_v54  ;;  %v688_v30 = vpop.f32.mrf.mxu2  ;;  %v722_v19 = vadd.f32 %v721_v56, %v2171_v8 }
 0x166   :  { %v1549_v34 = vpop.eup %1548  ;;  %1265 = vst [vmem:[#allocation6 + $0x1b0] sm:$0xff] %v1547_v57  ;;  %1552 = vpow2.f32 %v1095_v63  ;;  %v1099_v1 = vmul.f32 1.442695, %v927_v18  ;;  %v689_v53 = vadd.f32 %v688_v30, %v2106_v20  ;;  %v429_v55 = vpop.f32.mrf.mxu0 }
 0x167   :  { %1266 = vst [vmem:[#allocation6 + $0x1b8] sm:$0xff] %v1549_v34  ;;  %1554 = vpow2.f32 %v1097_v28  ;;  %v845_v39 = vadd.f32 %v2153_v47, %v722_v19  ;;  %v430_v60 = vadd.f32 %v429_v55, %v2089_v16  ;;  %v560_v11 = vpop.f32.mrf.mxu1 }
 0x168   :  { %1556 = vpow2.f32 %v1099_v1  ;;  %v812_v46 = vadd.f32 %v2153_v47, %v689_v53  ;;  %v561_v42 = vadd.f32 %v560_v11, %v2089_v16 }
 0x169   :  { %v961_v8 = vmin.f32 %v845_v39, %v2141_v22  ;;  %v813_v61 = vadd.f32 %v2128_v9, %v430_v60 }
 0x16a   :  { %v928_v15 = vmin.f32 %v812_v46, %v2141_v22  ;;  %v814_v20 = vadd.f32 %v2130_v13, %v561_v42 }
 0x16b   :  { %v1551_v48 = vpop.eup %1550  ;;  %v1167_v10 = vmul.f32 1.442695, %v961_v8  ;;  %v929_v58 = vmin.f32 %v813_v61, %v2141_v22 }
 0x16c   :  { %v1553_v6 = vpop.eup %1552  ;;  %1300 = vst [vmem:[#allocation6 + $0x2c8] sm:$0xff] %v1551_v48  ;;  %v1101_v43 = vmul.f32 1.442695, %v928_v15  ;;  %v930_v21 = vmin.f32 %v814_v20, %v2141_v22  ;;  %v724_v0 = vpop.f32.mrf.mxu3 }
 0x16d   :  { %v1555_v35 = vpop.eup %1554  ;;  %1267 = vst [vmem:[#allocation6 + $0x1c0] sm:$0xff] %v1553_v6  ;;  %1558 = vpow2.f32 %v1167_v10  ;;  %v1103_v7 = vmul.f32 1.442695, %v929_v58  ;;  %v691_v26 = vpop.f32.mrf.mxu2  ;;  %v725_v37 = vadd.f32 %v724_v0, %v2189_v27 }
 0x16e   :  { %v1557_v17 = vpop.eup %1556  ;;  %1268 = vst [vmem:[#allocation6 + $0x1c8] sm:$0xff] %v1555_v35  ;;  %1560 = vpow2.f32 %v1101_v43  ;;  %v1105_v33 = vmul.f32 1.442695, %v930_v21  ;;  %v692_v14 = vadd.f32 %v691_v26, %v2089_v16  ;;  %v432_v23 = vpop.f32.mrf.mxu0 }
 0x16f   :  { %1269 = vst [vmem:[#allocation6 + $0x1d0] sm:$0xff] %v1557_v17  ;;  %1562 = vpow2.f32 %v1103_v7  ;;  %v848_v12 = vadd.f32 %v2153_v47, %v725_v37  ;;  %v433_v31 = vadd.f32 %v432_v23, %v2110_v45  ;;  %v563_v32 = vpop.f32.mrf.mxu1 }
 0x170   :  { %1564 = vpow2.f32 %v1105_v33  ;;  %v815_v41 = vadd.f32 %v2153_v47, %v692_v14  ;;  %v564_v36 = vadd.f32 %v563_v32, %v2110_v45 }
 0x171   :  { %v964_v27 = vmin.f32 %v848_v12, %v2141_v22  ;;  %v816_v4 = vadd.f32 %v2128_v9, %v433_v31 }
 0x172   :  { %v931_v50 = vmin.f32 %v815_v41, %v2141_v22  ;;  %v817_v16 = vadd.f32 %v2130_v13, %v564_v36 }
 0x173   :  { %v1559_v54 = vpop.eup %1558  ;;  %v1173_v49 = vmul.f32 1.442695, %v964_v27  ;;  %v932_v63 = vmin.f32 %v816_v4, %v2141_v22 }
 0x174   :  { %v1561_v18 = vpop.eup %1560  ;;  %1303 = vst [vmem:[#allocation6 + $0x2e0] sm:$0xff] %v1559_v54  ;;  %v1107_v56 = vmul.f32 1.442695, %v931_v50  ;;  %v933_v57 = vmin.f32 %v817_v16, %v2141_v22  ;;  %v727_v28 = vpop.f32.mrf.mxu3 }
 0x175   :  { %v1563_v30 = vpop.eup %1562  ;;  %1270 = vst [vmem:[#allocation6 + $0x1d8] sm:$0xff] %v1561_v18  ;;  %1566 = vpow2.f32 %v1173_v49  ;;  %v1109_v19 = vmul.f32 1.442695, %v932_v63  ;;  %v694_v34 = vpop.f32.mrf.mxu2  ;;  %v728_v1 = vadd.f32 %v727_v28, %v2207_v44 }
 0x176   :  { %v1565_v53 = vpop.eup %1564  ;;  %1271 = vst [vmem:[#allocation6 + $0x1e0] sm:$0xff] %v1563_v30  ;;  %1568 = vpow2.f32 %v1107_v56  ;;  %v1111_v55 = vmul.f32 1.442695, %v933_v57  ;;  %v695_v39 = vadd.f32 %v694_v34, %v2110_v45  ;;  %v435_v60 = vpop.f32.mrf.mxu0 }
 0x177   :  { %1272 = vst [vmem:[#allocation6 + $0x1e8] sm:$0xff] %v1565_v53  ;;  %1570 = vpow2.f32 %v1109_v19  ;;  %v851_v11 = vadd.f32 %v2153_v47, %v728_v1  ;;  %v436_v46 = vadd.f32 %v435_v60, %v2116_v5  ;;  %v566_v42 = vpop.f32.mrf.mxu1 }
 0x178   :  { %1572 = vpow2.f32 %v1111_v55  ;;  %v818_v8 = vadd.f32 %v2153_v47, %v695_v39  ;;  %v567_v61 = vadd.f32 %v566_v42, %v2116_v5 }
 0x179   :  { %v967_v44 = vmin.f32 %v851_v11, %v2141_v22  ;;  %v819_v15 = vadd.f32 %v2128_v9, %v436_v46 }
 0x17a   :  { %v934_v20 = vmin.f32 %v818_v8, %v2141_v22  ;;  %v820_v45 = vadd.f32 %v2130_v13, %v567_v61 }
 0x17b   :  { %v1567_v48 = vpop.eup %1566  ;;  %v1179_v10 = vmul.f32 1.442695, %v967_v44  ;;  %v935_v58 = vmin.f32 %v819_v15, %v2141_v22 }
 0x17c   :  { %v1569_v6 = vpop.eup %1568  ;;  %1306 = vst [vmem:[#allocation6 + $0x2f8] sm:$0xff] %v1567_v48  ;;  %v1113_v43 = vmul.f32 1.442695, %v934_v20  ;;  %v936_v21 = vmin.f32 %v820_v45, %v2141_v22  ;;  %v730_v0 = vpop.f32.mrf.mxu3 }
 0x17d   :  { %v1571_v35 = vpop.eup %1570  ;;  %1273 = vst [vmem:[#allocation6 + $0x1f0] sm:$0xff] %v1569_v6  ;;  %1574 = vpow2.f32 %v1179_v10  ;;  %v1115_v7 = vmul.f32 1.442695, %v935_v58  ;;  %v697_v26 = vpop.f32.mrf.mxu2  ;;  %v731_v37 = vadd.f32 %v730_v0, %v2225_v52 }
 0x17e   :  { %v1573_v17 = vpop.eup %1572  ;;  %1274 = vst [vmem:[#allocation6 + $0x1f8] sm:$0xff] %v1571_v35  ;;  %1576 = vpow2.f32 %v1113_v43  ;;  %v1117_v33 = vmul.f32 1.442695, %v936_v21  ;;  %v698_v14 = vadd.f32 %v697_v26, %v2116_v5  ;;  %v438_v23 = vpop.f32.mrf.mxu0 }
 0x17f   :  { %1275 = vst [vmem:[#allocation6 + $0x200] sm:$0xff] %v1573_v17  ;;  %1578 = vpow2.f32 %v1115_v7  ;;  %v854_v12 = vadd.f32 %v2153_v47, %v731_v37  ;;  %v439_v31 = vadd.f32 %v438_v23, %v2104_v2  ;;  %v569_v32 = vpop.f32.mrf.mxu1 }
 0x180   :  { %1580 = vpow2.f32 %v1117_v33  ;;  %v821_v41 = vadd.f32 %v2153_v47, %v698_v14  ;;  %v570_v36 = vadd.f32 %v569_v32, %v2104_v2 }
 0x181   :  { %v970_v52 = vmin.f32 %v854_v12, %v2141_v22  ;;  %v822_v27 = vadd.f32 %v2128_v9, %v439_v31 }
 0x182   :  { %v937_v4 = vmin.f32 %v821_v41, %v2141_v22  ;;  %v823_v5 = vadd.f32 %v2130_v13, %v570_v36 }
 0x183   :  { %v1575_v50 = vpop.eup %1574  ;;  %v1185_v16 = vmul.f32 1.442695, %v970_v52  ;;  %v938_v54 = vmin.f32 %v822_v27, %v2141_v22 }
 0x184   :  { %v1577_v49 = vpop.eup %1576  ;;  %1309 = vst [vmem:[#allocation6 + $0x310] sm:$0xff] %v1575_v50  ;;  %v1119_v63 = vmul.f32 1.442695, %v937_v4  ;;  %v939_v18 = vmin.f32 %v823_v5, %v2141_v22  ;;  %v733_v56 = vpop.f32.mrf.mxu3 }
 0x185   :  { %v1579_v57 = vpop.eup %1578  ;;  %1276 = vst [vmem:[#allocation6 + $0x208] sm:$0xff] %v1577_v49  ;;  %1582 = vpow2.f32 %v1185_v16  ;;  %v1121_v28 = vmul.f32 1.442695, %v938_v54  ;;  %v700_v30 = vpop.f32.mrf.mxu2  ;;  %v734_v19 = vadd.f32 %v733_v56, %v2243_v3 }
 0x186   :  { %v1581_v34 = vpop.eup %1580  ;;  %1277 = vst [vmem:[#allocation6 + $0x210] sm:$0xff] %v1579_v57  ;;  %1584 = vpow2.f32 %v1119_v63  ;;  %v1123_v1 = vmul.f32 1.442695, %v939_v18  ;;  %v701_v53 = vadd.f32 %v700_v30, %v2104_v2  ;;  %v441_v55 = vpop.f32.mrf.mxu0 }
 0x187   :  { %1278 = vst [vmem:[#allocation6 + $0x218] sm:$0xff] %v1581_v34  ;;  %1586 = vpow2.f32 %v1121_v28  ;;  %v857_v39 = vadd.f32 %v2153_v47, %v734_v19  ;;  %v442_v60 = vadd.f32 %v441_v55, %v2125_v59  ;;  %v572_v11 = vpop.f32.mrf.mxu1 }
 0x188   :  { %1588 = vpow2.f32 %v1123_v1  ;;  %v824_v46 = vadd.f32 %v2153_v47, %v701_v53  ;;  %v573_v42 = vadd.f32 %v572_v11, %v2125_v59 }
 0x189   :  { %v973_v3 = vmin.f32 %v857_v39, %v2141_v22  ;;  %v825_v8 = vadd.f32 %v2128_v9, %v442_v60 }
 0x18a   :  { %v940_v61 = vmin.f32 %v824_v46, %v2141_v22  ;;  %v826_v2 = vadd.f32 %v2130_v13, %v573_v42 }
 0x18b   :  { %v1583_v44 = vpop.eup %1582  ;;  %v1191_v15 = vmul.f32 1.442695, %v973_v3  ;;  %v941_v20 = vmin.f32 %v825_v8, %v2141_v22 }
 0x18c   :  { %v1585_v45 = vpop.eup %1584  ;;  %1312 = vst [vmem:[#allocation6 + $0x328] sm:$0xff] %v1583_v44  ;;  %v1125_v48 = vmul.f32 1.442695, %v940_v61  ;;  %v942_v10 = vmin.f32 %v826_v2, %v2141_v22  ;;  %v736_v58 = vpop.f32.mrf.mxu3 }
 0x18d   :  { %v1587_v6 = vpop.eup %1586  ;;  %1279 = vst [vmem:[#allocation6 + $0x220] sm:$0xff] %v1585_v45  ;;  %1590 = vpow2.f32 %v1191_v15  ;;  %v1127_v43 = vmul.f32 1.442695, %v941_v20  ;;  %v703_v21 = vpop.f32.mrf.mxu2  ;;  %v737_v0 = vadd.f32 %v736_v58, %v2261_v51 }
 0x18e   :  { %v1589_v35 = vpop.eup %1588  ;;  %1280 = vst [vmem:[#allocation6 + $0x228] sm:$0xff] %v1587_v6  ;;  %1592 = vpow2.f32 %v1125_v48  ;;  %v1129_v7 = vmul.f32 1.442695, %v942_v10  ;;  %v704_v26 = vadd.f32 %v703_v21, %v2125_v59  ;;  %v444_v37 = vpop.f32.mrf.mxu0 }
 0x18f   :  { %1281 = vst [vmem:[#allocation6 + $0x230] sm:$0xff] %v1589_v35  ;;  %1594 = vpow2.f32 %v1127_v43  ;;  %v860_v17 = vadd.f32 %v2153_v47, %v737_v0  ;;  %v445_v33 = vadd.f32 %v444_v37, %v2135_v29  ;;  %v575_v14 = vpop.f32.mrf.mxu1 }
 0x190   :  { %1596 = vpow2.f32 %v1129_v7  ;;  %v827_v23 = vadd.f32 %v2153_v47, %v704_v26  ;;  %v576_v12 = vadd.f32 %v575_v14, %v2135_v29 }
 0x191   :  { %v976_v51 = vmin.f32 %v860_v17, %v2141_v22  ;;  %v828_v31 = vadd.f32 %v2128_v9, %v445_v33 }
 0x192   :  { %v943_v32 = vmin.f32 %v827_v23, %v2141_v22  ;;  %v829_v59 = vadd.f32 %v2130_v13, %v576_v12 }
 0x193   :  { %v1591_v41 = vpop.eup %1590  ;;  %v1197_v36 = vmul.f32 1.442695, %v976_v51  ;;  %v944_v52 = vmin.f32 %v828_v31, %v2141_v22 }
 0x194   :  { %v1593_v27 = vpop.eup %1592  ;;  %1315 = vst [vmem:[#allocation6 + $0x340] sm:$0xff] %v1591_v41  ;;  %v1131_v4 = vmul.f32 1.442695, %v943_v32  ;;  %v945_v5 = vmin.f32 %v829_v59, %v2141_v22  ;;  %v739_v50 = vpop.f32.mrf.mxu3 }
 0x195   :  { %v1595_v16 = vpop.eup %1594  ;;  %1282 = vst [vmem:[#allocation6 + $0x238] sm:$0xff] %v1593_v27  ;;  %1598 = vpow2.f32 %v1197_v36  ;;  %v1133_v54 = vmul.f32 1.442695, %v944_v52  ;;  %v706_v49 = vpop.f32.mrf.mxu2  ;;  %v740_v63 = vadd.f32 %v739_v50, %v2279_v40 }
 0x196   :  { %v1597_v18 = vpop.eup %1596  ;;  %1283 = vst [vmem:[#allocation6 + $0x240] sm:$0xff] %v1595_v16  ;;  %1600 = vpow2.f32 %v1131_v4  ;;  %v1135_v56 = vmul.f32 1.442695, %v945_v5  ;;  %v707_v57 = vadd.f32 %v706_v49, %v2135_v29  ;;  %v447_v28 = vpop.f32.mrf.mxu0 }
 0x197   :  { %1284 = vst [vmem:[#allocation6 + $0x248] sm:$0xff] %v1597_v18  ;;  %1602 = vpow2.f32 %v1133_v54  ;;  %v863_v30 = vadd.f32 %v2153_v47, %v740_v63  ;;  %v448_v19 = vadd.f32 %v447_v28, %v2119_v24  ;;  %v578_v34 = vpop.f32.mrf.mxu1 }
 0x198   :  { %1604 = vpow2.f32 %v1135_v56  ;;  %v830_v1 = vadd.f32 %v2153_v47, %v707_v57  ;;  %v579_v53 = vadd.f32 %v578_v34, %v2119_v24 }
 0x199   :  { %v979_v40 = vmin.f32 %v863_v30, %v2141_v22  ;;  %v831_v55 = vadd.f32 %v2128_v9, %v448_v19 }
 0x19a   :  { %v946_v39 = vmin.f32 %v830_v1, %v2141_v22  ;;  %v832_v29 = vadd.f32 %v2130_v13, %v579_v53 }
 0x19b   :  { %v1599_v60 = vpop.eup %1598  ;;  %v1203_v11 = vmul.f32 1.442695, %v979_v40  ;;  %v947_v46 = vmin.f32 %v831_v55, %v2141_v22 }
 0x19c   :  { %v1601_v42 = vpop.eup %1600  ;;  %1318 = vst [vmem:[#allocation6 + $0x358] sm:$0xff] %v1599_v60  ;;  %v1137_v3 = vmul.f32 1.442695, %v946_v39  ;;  %v948_v8 = vmin.f32 %v832_v29, %v2141_v22  ;;  %v742_v61 = vpop.f32.mrf.mxu3 }
 0x19d   :  { %v1603_v2 = vpop.eup %1602  ;;  %1285 = vst [vmem:[#allocation6 + $0x250] sm:$0xff] %v1601_v42  ;;  %1606 = vpow2.f32 %v1203_v11  ;;  %v1139_v44 = vmul.f32 1.442695, %v947_v46  ;;  %v709_v15 = vpop.f32.mrf.mxu2  ;;  %v743_v20 = vadd.f32 %v742_v61, %v2297_v62 }
 0x19e   :  { %v1605_v45 = vpop.eup %1604  ;;  %1286 = vst [vmem:[#allocation6 + $0x258] sm:$0xff] %v1603_v2  ;;  %1608 = vpow2.f32 %v1137_v3  ;;  %v1141_v48 = vmul.f32 1.442695, %v948_v8  ;;  %v710_v10 = vadd.f32 %v709_v15, %v2119_v24  ;;  %v450_v58 = vpop.f32.mrf.mxu0 }
 0x19f   :  { %1287 = vst [vmem:[#allocation6 + $0x260] sm:$0xff] %v1605_v45  ;;  %1610 = vpow2.f32 %v1139_v44  ;;  %v866_v6 = vadd.f32 %v2153_v47, %v743_v20  ;;  %v451_v43 = vadd.f32 %v450_v58, %v2149_v38  ;;  %v581_v21 = vpop.f32.mrf.mxu1 }
 0x1a0   :  { %1612 = vpow2.f32 %v1141_v48  ;;  %v833_v0 = vadd.f32 %v2153_v47, %v710_v10  ;;  %v582_v35 = vadd.f32 %v581_v21, %v2149_v38 }
 0x1a1   :  { %v982_v62 = vmin.f32 %v866_v6, %v2141_v22  ;;  %v834_v7 = vadd.f32 %v2128_v9, %v451_v43 }
 0x1a2   :  { %v949_v26 = vmin.f32 %v833_v0, %v2141_v22  ;;  %v835_v24 = vadd.f32 %v2130_v13, %v582_v35 }
 0x1a3   :  { %v1607_v37 = vpop.eup %1606  ;;  %v1209_v17 = vmul.f32 1.442695, %v982_v62  ;;  %v950_v33 = vmin.f32 %v834_v7, %v2141_v22 }
 0x1a4   :  { %v1609_v14 = vpop.eup %1608  ;;  %1321 = vst [vmem:[#allocation6 + $0x370] sm:$0xff] %v1607_v37  ;;  %v1143_v23 = vmul.f32 1.442695, %v949_v26  ;;  %v951_v12 = vmin.f32 %v835_v24, %v2141_v22 }
 0x1a5   :  { %v1611_v51 = vpop.eup %1610  ;;  %1288 = vst [vmem:[#allocation6 + $0x268] sm:$0xff] %v1609_v14  ;;  %1614 = vpow2.f32 %v1209_v17  ;;  %v1145_v31 = vmul.f32 1.442695, %v950_v33  ;;  %v712_v32 = vpop.f32.mrf.mxu2 }
 0x1a6   :  { %v1613_v59 = vpop.eup %1612  ;;  %1289 = vst [vmem:[#allocation6 + $0x270] sm:$0xff] %v1611_v51  ;;  %1616 = vpow2.f32 %v1143_v23  ;;  %v1147_v41 = vmul.f32 1.442695, %v951_v12  ;;  %v713_v36 = vadd.f32 %v712_v32, %v2149_v38  ;;  %v453_v52 = vpop.f32.mrf.mxu0 }
 0x1a7   :  { %1290 = vst [vmem:[#allocation6 + $0x278] sm:$0xff] %v1613_v59  ;;  %1618 = vpow2.f32 %v1145_v31  ;;  %v454_v27 = vadd.f32 %v453_v52, %v2164_v25  ;;  %v584_v4 = vpop.f32.mrf.mxu1 }
 0x1a8   :  { %1620 = vpow2.f32 %v1147_v41  ;;  %v836_v5 = vadd.f32 %v2153_v47, %v713_v36  ;;  %v585_v50 = vadd.f32 %v584_v4, %v2164_v25 }
 0x1a9   :  { %v837_v16 = vadd.f32 %v2128_v9, %v454_v27 }
 0x1aa   :  { %v952_v54 = vmin.f32 %v836_v5, %v2141_v22  ;;  %v838_v49 = vadd.f32 %v2130_v13, %v585_v50 }
 0x1ab   :  { %v1615_v63 = vpop.eup %1614  ;;  %v953_v38 = vmin.f32 %v837_v16, %v2141_v22 }
 0x1ac   :  { %v1617_v18 = vpop.eup %1616  ;;  %1324 = vst [vmem:[#allocation6 + $0x388] sm:$0xff] %v1615_v63  ;;  %v1149_v56 = vmul.f32 1.442695, %v952_v54  ;;  %v954_v57 = vmin.f32 %v838_v49, %v2141_v22 }
 0x1ad   :  { %v1619_v28 = vpop.eup %1618  ;;  %1291 = vst [vmem:[#allocation6 + $0x280] sm:$0xff] %v1617_v18  ;;  %v1151_v30 = vmul.f32 1.442695, %v953_v38  ;;  %v715_v19 = vpop.f32.mrf.mxu2 }
 0x1ae   :  { %v1621_v34 = vpop.eup %1620  ;;  %1292 = vst [vmem:[#allocation6 + $0x288] sm:$0xff] %v1619_v28  ;;  %1622 = vpow2.f32 %v1149_v56  ;;  %v1153_v9 = vmul.f32 1.442695, %v954_v57  ;;  %v716_v1 = vadd.f32 %v715_v19, %v2164_v25 }
 0x1af   :  { %1293 = vst [vmem:[#allocation6 + $0x290] sm:$0xff] %v1621_v34  ;;  %1624 = vpow2.f32 %v1151_v30 }
 0x1b0   :  { %1626 = vpow2.f32 %v1153_v9  ;;  %v839_v13 = vadd.f32 %v2153_v47, %v716_v1 }
 0x1b2   :  { %v955_v53 = vmin.f32 %v839_v13, %v2141_v22 }
 0x1b4   :  { %v1623_v40 = vpop.eup %1622  ;;  %v1155_v55 = vmul.f32 1.442695, %v955_v53 }
 0x1b5   :  { %v1625_v39 = vpop.eup %1624  ;;  %1294 = vst [vmem:[#allocation6 + $0x298] sm:$0xff] %v1623_v40 }
 0x1b6   :  { %v1627_v29 = vpop.eup %1626  ;;  %1295 = vst [vmem:[#allocation6 + $0x2a0] sm:$0xff] %v1625_v39  ;;  %1628 = vpow2.f32 %v1155_v55 }
 0x1b7   :  { %1296 = vst [vmem:[#allocation6 + $0x2a8] sm:$0xff] %v1627_v29 }
 0x1bc   :  { %v1629_v25 = vpop.eup %1628 }
 0x1bd   :  { %1297 = vst [vmem:[#allocation6 + $0x2b0] sm:$0xff] %v1629_v25 }
 0x1be   :  { %1337 = dma.vmem_to_hbm [thread:$0]  %s1330_s21, 14592, %s1332_s24, [#allocation5], %s1687_s4, %s1687_s4, %s1688_s0  }
 0x1bf   :  { %1680 = dma.done.wait [#allocation5], 14592  }
 0x1c0   :  { %1681 = vsyncadd [#allocation5], 4294952704 }
 0x1c1   :  { %1342 = vsyncpa [#allocation4], 1 }
 0x1c2   :  { %1343 = vsyncpa [#allocation5], 1 }

</bundles_post_ra>
